<compile_context>
chip_gen: v7x
topology: tpu7x:2x2x1
jax: 0.10.0
libtpu: 0.0.40
codegen_flags: <defaults>
</compile_context>

<pallas_src>
from functools import partial

import jax
import jax.numpy as jnp
from jax.experimental import pallas as pl
from jax.experimental.pallas import tpu as pltpu

EPS = 1e-5               # torch.nn.LayerNorm default eps
GELU_APPROXIMATE = True  # tanh GELU (EUP slot) instead of exact erf (VALU)


def _vmem_capacity_bytes():
    """Physical VMEM of the attached TPU; conservative (v7x, 64 MiB) fallback."""
    try:
        info = pltpu.get_tpu_info()
        cap = getattr(info, "vmem_capacity_bytes", None)
        if cap:
            return int(cap)
    except Exception:
        pass
    return 64 * 1024 * 1024


_VMEM_CAP = _vmem_capacity_bytes()
if _VMEM_CAP >= 100 * 1024 * 1024:     # v5e / v6e: 128 MiB physical VMEM
    _VMEM_LIMIT = 96 * 1024 * 1024
    _FFN_MAX_TILE = 2048
else:                                   # v7x (64 MiB physical) or unknown
    _VMEM_LIMIT = 56 * 1024 * 1024
    _FFN_MAX_TILE = 1024


def _layernorm(x, g, b):
    # statistics in f32; g, b are (1, D)
    x = x.astype(jnp.float32)
    mu = jnp.mean(x, axis=-1, keepdims=True)
    var = jnp.mean((x - mu) ** 2, axis=-1, keepdims=True)
    return (x - mu) * jax.lax.rsqrt(var + EPS) * g + b


# ---------------------------------------------------------------------------
# One pre-norm transformer encoder block (x-transformers Encoder layer), with
# optionally-fused positional-embedding add (first layer) and final LayerNorm
# (last layer).  Grid = (batch tiles, FFN hidden-dim tiles).
# ---------------------------------------------------------------------------
def transformer_block_kernel(x_ref, pos_ref, ln1g_ref, ln1b_ref, wqkv_ref,
                             wo_ref, bo_ref, ln2g_ref, ln2b_ref,
                             w1_ref, b1_ref, w2_ref, b2_ref,
                             fing_ref, finb_ref, o_ref,
                             xmid_ref, xn2_ref, acc_ref,
                             *, heads, dim_head, add_pos, final_ln):
    f = pl.program_id(1)
    Bt, S, D = x_ref.shape
    M = Bt * S
    inner = heads * dim_head           # I

    # ---- attention + FFN pre-norm: done once per batch tile (f == 0) -------
    @pl.when(f == 0)
    def _attention():
        x = x_ref[...].astype(jnp.float32)                      # [Bt, S, D]
        if add_pos:                                             # fused tok+pos add
            x = x + pos_ref[...][None, :, :]
        xf = x.reshape(M, D)                                    # pack rows for MXU

        # pre-norm multi-head self-attention (no bias on q/k/v)
        xn = _layernorm(xf, ln1g_ref[...], ln1b_ref[...]).astype(jnp.bfloat16)

        # single fused QKV projection: (M, D) x (D, 3I) on the MXU
        qkv = jnp.dot(xn, wqkv_ref[...],
                      preferred_element_type=jnp.float32).astype(jnp.bfloat16)
        q_all = qkv[:, :inner]                                  # 128-aligned splits
        k_all = qkv[:, inner:2 * inner]
        v_all = qkv[:, 2 * inner:]

        scale = dim_head ** -0.5
        o_heads = []
        for h in range(heads):          # static unroll; per-head score/PV is inherent to MHA
            sl = slice(h * dim_head, (h + 1) * dim_head)
            qh = q_all[:, sl].reshape(Bt, S, dim_head)
            kh = k_all[:, sl].reshape(Bt, S, dim_head)
            vh = v_all[:, sl].reshape(Bt, S, dim_head)
            s = jnp.einsum("bqd,bkd->bqk", qh, kh,
                           preferred_element_type=jnp.float32) * scale
            s = s - jnp.max(s, axis=-1, keepdims=True)
            p = jnp.exp(s)
            p = p * pl.reciprocal(jnp.sum(p, axis=-1, keepdims=True), approx=True)
            oh = jnp.einsum("bqk,bkd->bqd", p.astype(jnp.bfloat16), vh,
                            preferred_element_type=jnp.float32)
            o_heads.append(oh.reshape(M, dim_head).astype(jnp.bfloat16))
        o_flat = jnp.concatenate(o_heads, axis=-1)              # (M, I) bf16

        # single output projection: head-sum happens inside the MXU K contraction
        attn = jnp.dot(o_flat, wo_ref[...],
                       preferred_element_type=jnp.float32) + bo_ref[...]

        xmid = xf + attn                                        # residual (pre-norm)
        xmid_ref[...] = xmid
        # FFN pre-norm computed once, reused by every F-tile step
        xn2_ref[...] = _layernorm(xmid, ln2g_ref[...],
                                  ln2b_ref[...]).astype(jnp.bfloat16)

    # ---- feedforward, tiled over the hidden (F) dimension -------------------
    h1 = jnp.dot(xn2_ref[...], w1_ref[...],
                 preferred_element_type=jnp.float32) + b1_ref[...]
    h1 = jax.nn.gelu(h1, approximate=GELU_APPROXIMATE)
    part = jnp.dot(h1.astype(jnp.bfloat16), w2_ref[...],
                   preferred_element_type=jnp.float32)

    @pl.when(f == 0)
    def _init_acc():
        acc_ref[...] = part             # init with first tile (no zero + RMW)

    @pl.when(f > 0)
    def _accumulate():
        acc_ref[...] += part

    @pl.when(f == pl.num_programs(1) - 1)
    def _finalize():
        y = xmid_ref[...] + acc_ref[...] + b2_ref[...]          # FFN residual
        if final_ln:                                            # fused TransformerWrapper.norm
            y = _layernorm(y, fing_ref[...], finb_ref[...])
        o_ref[...] = y.reshape(Bt, S, D).astype(o_ref.dtype)


def _pick_batch_tile(B, S, target=256):
    """Divisor Bt of B, preferring nb>=2 (v7x megacore), M=Bt*S%8==0, M>=target,
    then the smallest such M."""
    divisors = [d for d in range(1, B + 1) if B % d == 0]

    def score(bt):
        M, nb = bt * S, B // bt
        return (0 if (B == 1 or nb >= 2) else 1,
                0 if M % 8 == 0 else 1,
                0 if M >= target else 1,
                M)

    return min(divisors, key=score)


def _pick_ffn_tile(F, max_tile):
    """FFN hidden-dim tile: full F if small, else a 128-multiple divisor."""
    if F <= max_tile:
        return F
    ft = (max_tile // 128) * 128
    while ft >= 128:
        if F % ft == 0:
            return ft
        ft -= 128
    return F


def transformer_block(x, pos, p, final_g, final_b, *, heads, dim_head,
                      add_pos, final_ln):
    B, S, D = x.shape
    inner = heads * dim_head
    F = p["w1"].shape[1]
    Bt = _pick_batch_tile(B, S)
    Ft = _pick_ffn_tile(F, _FFN_MAX_TILE)
    nb, nf = B // Bt, F // Ft
    M = Bt * S

    def inv(shape):  # grid-invariant input (fetched once; block = full array)
        return pl.BlockSpec(shape, lambda b, f: (0,) * len(shape))

    kernel = partial(transformer_block_kernel, heads=heads, dim_head=dim_head,
                     add_pos=add_pos, final_ln=final_ln)

    return pl.pallas_call(
        kernel,
        out_shape=jax.ShapeDtypeStruct((B, S, D), x.dtype),
        grid=(nb, nf),
        in_specs=[
            pl.BlockSpec((Bt, S, D), lambda b, f: (b, 0, 0)),   # x (batch tile)
            inv((S, D)),                                        # pos emb
            inv((1, D)), inv((1, D)),                           # ln1 gamma/beta
            inv((D, 3 * inner)),                                # fused Wqkv (bf16, [q|k|v])
            inv((inner, D)),                                    # flat Wo (bf16)
            inv((1, D)),                                        # bo
            inv((1, D)), inv((1, D)),                           # ln2 gamma/beta
            pl.BlockSpec((D, Ft), lambda b, f: (0, f)),         # W1 tile (bf16)
            pl.BlockSpec((1, Ft), lambda b, f: (0, f)),         # b1 tile
            pl.BlockSpec((Ft, D), lambda b, f: (f, 0)),         # W2 tile (bf16)
            inv((1, D)),                                        # b2
            inv((1, D)), inv((1, D)),                           # final LN gamma/beta
        ],
        out_specs=pl.BlockSpec((Bt, S, D), lambda b, f: (b, 0, 0)),
        scratch_shapes=[
            pltpu.VMEM((M, D), jnp.float32),    # post-attention residual
            pltpu.VMEM((M, D), jnp.bfloat16),   # LN2(x) reused by every F tile
            pltpu.VMEM((M, D), jnp.float32),    # FFN accumulator
        ],
        compiler_params=pltpu.CompilerParams(
            dimension_semantics=("parallel", "arbitrary"),
            vmem_limit_bytes=_VMEM_LIMIT,
        ),
    )(x, pos, p["ln1_g"], p["ln1_b"], p["wqkv"], p["wo"], p["bo"],
      p["ln2_g"], p["ln2_b"], p["w1"], p["b1"], p["w2"], p["b2"],
      final_g, final_b)


# ---------------------------------------------------------------------------
# Parameter construction (deterministic, synthetic weights).
# Matmul weights are stored in bf16 (MXU operands); norms/biases in f32.
# ---------------------------------------------------------------------------
def init_params(key, *, n_embed, n_layer, vocab_size, max_seq_len,
                heads, dim_head, ff_mult):
    D, inner, F = n_embed, heads * dim_head, n_embed * ff_mult
    keys = jax.random.split(key, 2 + n_layer)

    params = {
        "tok_emb": 0.02 * jax.random.normal(keys[0], (vocab_size, D), jnp.float32),
        "pos_emb": 0.02 * jax.random.normal(keys[1], (max_seq_len, D), jnp.float32),
        "final_g": jnp.ones((1, D), jnp.float32),
        "final_b": jnp.zeros((1, D), jnp.float32),
        "layers": [],
    }
    for layer in range(n_layer):
        ks = jax.random.split(keys[2 + layer], 6)
        wq = 0.02 * jax.random.normal(ks[0], (D, inner), jnp.float32)
        wk = 0.02 * jax.random.normal(ks[1], (D, inner), jnp.float32)
        wv = 0.02 * jax.random.normal(ks[2], (D, inner), jnp.float32)
        wo = 0.02 * jax.random.normal(ks[3], (inner, D), jnp.float32)
        params["layers"].append({
            "ln1_g": jnp.ones((1, D), jnp.float32),
            "ln1_b": jnp.zeros((1, D), jnp.float32),
            # fused QKV weight, contiguous [q | k | v] column blocks: (D, 3I) bf16
            "wqkv": jnp.concatenate([wq, wk, wv], axis=1).astype(jnp.bfloat16),
            # flat output projection: (I, D) bf16 (head sum folds into K contraction)
            "wo": wo.astype(jnp.bfloat16),
            "bo": jnp.zeros((1, D), jnp.float32),
            "ln2_g": jnp.ones((1, D), jnp.float32),
            "ln2_b": jnp.zeros((1, D), jnp.float32),
            "w1": (0.02 * jax.random.normal(ks[4], (D, F), jnp.float32)).astype(jnp.bfloat16),
            "b1": jnp.zeros((1, F), jnp.float32),
            "w2": (0.02 * jax.random.normal(ks[5], (F, D), jnp.float32)).astype(jnp.bfloat16),
            "b2": jnp.zeros((1, D), jnp.float32),
        })
    return params


# ---------------------------------------------------------------------------
# Full BERTEmbedder forward: tokens -> embeddings  (return_embeddings=True)
# ---------------------------------------------------------------------------
def bert_embedder_forward(tokens, params, *, heads, dim_head):
    B, S = tokens.shape
    # Embedding lookup is a gather (glue); the tok+pos add is fused into the
    # first transformer block, the final LayerNorm into the last block.
    x = params["tok_emb"][tokens]              # [B, S, D] f32 residual stream
    pos = params["pos_emb"][:S]                # [S, D]
    # emb_dropout = 0.0 -> identity
    n_layer = len(params["layers"])
    for i, lp in enumerate(params["layers"]):
        x = transformer_block(
            x, pos, lp, params["final_g"], params["final_b"],
            heads=heads, dim_head=dim_head,
            add_pos=(i == 0),
            final_ln=(i == n_layer - 1))
    return x


if __name__ == "__main__":
    # Small shapes consistent with BERTEmbedder(n_embed, n_layer):
    B, S = 2, 8                  # batch, sequence (max_seq_len)
    n_embed, n_layer = 128, 2
    vocab_size, max_seq_len = 100, 8
    heads, dim_head, ff_mult = 4, 32, 4   # x-transformers defaults are 8/64; scaled down

    key = jax.random.PRNGKey(0)
    k_param, k_tok = jax.random.split(key)
    params = init_params(k_param, n_embed=n_embed, n_layer=n_layer,
                         vocab_size=vocab_size, max_seq_len=max_seq_len,
                         heads=heads, dim_head=dim_head, ff_mult=ff_mult)
    tokens = jax.random.randint(k_tok, (B, S), 0, vocab_size, dtype=jnp.int32)

    z = bert_embedder_forward(tokens, params, heads=heads, dim_head=dim_head)
    z = jax.block_until_ready(z)

    assert z.shape == (B, S, n_embed), z.shape
    assert bool(jnp.all(jnp.isfinite(z)))
    print("KERNEL_OK")
</pallas_src>

<mosaic_0001>
module attributes {stable_mosaic.version = 11 : i64} {
  func.func @transformer_block_kernel(%arg0: i32, %arg1: i32, %arg2: memref<1x8x128xf32, #tpu.memory_space<vmem>>, %arg3: memref<8x128xf32, #tpu.memory_space<vmem>>, %arg4: memref<1x128xf32, #tpu.memory_space<vmem>>, %arg5: memref<1x128xf32, #tpu.memory_space<vmem>>, %arg6: memref<128x384xbf16, #tpu.memory_space<vmem>>, %arg7: memref<128x128xbf16, #tpu.memory_space<vmem>>, %arg8: memref<1x128xf32, #tpu.memory_space<vmem>>, %arg9: memref<1x128xf32, #tpu.memory_space<vmem>>, %arg10: memref<1x128xf32, #tpu.memory_space<vmem>>, %arg11: memref<128x512xbf16, #tpu.memory_space<vmem>>, %arg12: memref<1x512xf32, #tpu.memory_space<vmem>>, %arg13: memref<512x128xbf16, #tpu.memory_space<vmem>>, %arg14: memref<1x128xf32, #tpu.memory_space<vmem>>, %arg15: memref<1x128xf32, #tpu.memory_space<vmem>>, %arg16: memref<1x128xf32, #tpu.memory_space<vmem>>, %arg17: memref<1x8x128xf32, #tpu.memory_space<vmem>>, %arg18: memref<8x128xf32, #tpu.memory_space<vmem>>, %arg19: memref<8x128xbf16, #tpu.memory_space<vmem>>, %arg20: memref<8x128xf32, #tpu.memory_space<vmem>>) attributes {dimension_semantics = [#tpu.dimension_semantics<parallel>, #tpu.dimension_semantics<arbitrary>], iteration_bounds = array<i64: 2, 1>, scalar_prefetch = 0 : i64, scratch_operands = 3 : i64, tpu.core_type = #tpu.core_type<tc>, window_params = [{transform_indices = @transform_0, window_bounds = array<i64: 1, 8, 128>}, {pipeline_mode = #tpu.pipeline_mode<synchronous>, transform_indices = @transform_1, window_bounds = array<i64: 8, 128>}, {pipeline_mode = #tpu.pipeline_mode<synchronous>, transform_indices = @transform_2, window_bounds = array<i64: 1, 128>}, {pipeline_mode = #tpu.pipeline_mode<synchronous>, transform_indices = @transform_3, window_bounds = array<i64: 1, 128>}, {pipeline_mode = #tpu.pipeline_mode<synchronous>, transform_indices = @transform_4, window_bounds = array<i64: 128, 384>}, {pipeline_mode = #tpu.pipeline_mode<synchronous>, transform_indices = @transform_5, window_bounds = array<i64: 128, 128>}, {pipeline_mode = #tpu.pipeline_mode<synchronous>, transform_indices = @transform_6, window_bounds = array<i64: 1, 128>}, {pipeline_mode = #tpu.pipeline_mode<synchronous>, transform_indices = @transform_7, window_bounds = array<i64: 1, 128>}, {pipeline_mode = #tpu.pipeline_mode<synchronous>, transform_indices = @transform_8, window_bounds = array<i64: 1, 128>}, {transform_indices = @transform_9, window_bounds = array<i64: 128, 512>}, {transform_indices = @transform_10, window_bounds = array<i64: 1, 512>}, {transform_indices = @transform_11, window_bounds = array<i64: 512, 128>}, {pipeline_mode = #tpu.pipeline_mode<synchronous>, transform_indices = @transform_12, window_bounds = array<i64: 1, 128>}, {pipeline_mode = #tpu.pipeline_mode<synchronous>, transform_indices = @transform_13, window_bounds = array<i64: 1, 128>}, {pipeline_mode = #tpu.pipeline_mode<synchronous>, transform_indices = @transform_14, window_bounds = array<i64: 1, 128>}, {transform_indices = @transform_15, window_bounds = array<i64: 1, 8, 128>}]} {
    %c0_i32 = arith.constant 0 : i32
    %0 = arith.cmpi eq, %arg1, %c0_i32 : i32
    %1 = arith.extui %0 : i1 to i32
    %c0_i32_0 = arith.constant 0 : i32
    %2 = arith.cmpi ne, %1, %c0_i32_0 : i32
    scf.if %2 {
      %c0_19 = arith.constant 0 : index
      %c0_20 = arith.constant 0 : index
      %c0_21 = arith.constant 0 : index
      %34 = vector.load %arg2[%c0_19, %c0_20, %c0_21] : memref<1x8x128xf32, #tpu.memory_space<vmem>>, vector<1x8x128xf32>
      %c0_22 = arith.constant 0 : index
      %c0_23 = arith.constant 0 : index
      %35 = vector.load %arg3[%c0_22, %c0_23] : memref<8x128xf32, #tpu.memory_space<vmem>>, vector<8x128xf32>
      %36 = vector.shape_cast %35 : vector<8x128xf32> to vector<1x8x128xf32>
      %37 = arith.addf %34, %36 : vector<1x8x128xf32>
      %38 = vector.shape_cast %37 : vector<1x8x128xf32> to vector<8x128xf32>
      %c0_24 = arith.constant 0 : index
      %c0_25 = arith.constant 0 : index
      %39 = vector.load %arg4[%c0_24, %c0_25] : memref<1x128xf32, #tpu.memory_space<vmem>>, vector<1x128xf32>
      %c0_26 = arith.constant 0 : index
      %c0_27 = arith.constant 0 : index
      %40 = vector.load %arg5[%c0_26, %c0_27] : memref<1x128xf32, #tpu.memory_space<vmem>>, vector<1x128xf32>
      %cst_28 = arith.constant dense<0.000000e+00> : vector<8xf32>
      %41 = vector.multi_reduction <add>, %38, %cst_28 [1] : vector<8x128xf32> to vector<8xf32>
      %42 = vector.shape_cast %41 : vector<8xf32> to vector<8x1xf32>
      %cst_29 = arith.constant 1.280000e+02 : f32
      %43 = vector.broadcast %cst_29 : f32 to vector<8x1xf32>
      %44 = arith.divf %42, %43 : vector<8x1xf32>
      %45 = vector.broadcast %44 : vector<8x1xf32> to vector<8x128xf32>
      %46 = arith.subf %38, %45 : vector<8x128xf32>
      %47 = arith.mulf %46, %46 : vector<8x128xf32>
      %cst_30 = arith.constant dense<0.000000e+00> : vector<8xf32>
      %48 = vector.multi_reduction <add>, %47, %cst_30 [1] : vector<8x128xf32> to vector<8xf32>
      %49 = vector.shape_cast %48 : vector<8xf32> to vector<8x1xf32>
      %cst_31 = arith.constant 1.280000e+02 : f32
      %50 = vector.broadcast %cst_31 : f32 to vector<8x1xf32>
      %51 = arith.divf %49, %50 : vector<8x1xf32>
      %52 = vector.broadcast %44 : vector<8x1xf32> to vector<8x128xf32>
      %53 = arith.subf %38, %52 : vector<8x128xf32>
      %cst_32 = arith.constant 9.99999974E-6 : f32
      %54 = vector.broadcast %cst_32 : f32 to vector<8x1xf32>
      %55 = arith.addf %51, %54 : vector<8x1xf32>
      %56 = math.rsqrt %55 : vector<8x1xf32>
      %57 = vector.broadcast %56 : vector<8x1xf32> to vector<8x128xf32>
      %58 = arith.mulf %53, %57 : vector<8x128xf32>
      %59 = vector.broadcast %39 : vector<1x128xf32> to vector<8x128xf32>
      %60 = arith.mulf %58, %59 : vector<8x128xf32>
      %61 = vector.broadcast %40 : vector<1x128xf32> to vector<8x128xf32>
      %62 = arith.addf %60, %61 : vector<8x128xf32>
      %63 = arith.truncf %62 : vector<8x128xf32> to vector<8x128xbf16>
      %c0_33 = arith.constant 0 : index
      %c0_34 = arith.constant 0 : index
      %64 = vector.load %arg6[%c0_33, %c0_34] : memref<128x384xbf16, #tpu.memory_space<vmem>>, vector<128x384xbf16>
      %cst_35 = arith.constant dense<0.000000e+00> : vector<8x384xf32>
      %65 = tpu.matmul %63, %64, %cst_35 {dimension_numbers = #tpu.dot_dimension_numbers<[1], [0], [0], [1], [0, 0, 1, 1], [], []>} : vector<8x128xbf16>, vector<128x384xbf16>, vector<8x384xf32> -> vector<8x384xf32>
      %66 = arith.truncf %65 : vector<8x384xf32> to vector<8x384xbf16>
      %67 = vector.extract_strided_slice %66 {offsets = [0, 0], sizes = [8, 128], strides = [1, 1]} : vector<8x384xbf16> to vector<8x128xbf16>
      %68 = vector.extract_strided_slice %66 {offsets = [0, 128], sizes = [8, 128], strides = [1, 1]} : vector<8x384xbf16> to vector<8x128xbf16>
      %69 = vector.extract_strided_slice %66 {offsets = [0, 256], sizes = [8, 128], strides = [1, 1]} : vector<8x384xbf16> to vector<8x128xbf16>
      %70 = vector.extract_strided_slice %67 {offsets = [0, 0], sizes = [8, 32], strides = [1, 1]} : vector<8x128xbf16> to vector<8x32xbf16>
      %71 = vector.shape_cast %70 : vector<8x32xbf16> to vector<1x8x32xbf16>
      %72 = vector.extract_strided_slice %68 {offsets = [0, 0], sizes = [8, 32], strides = [1, 1]} : vector<8x128xbf16> to vector<8x32xbf16>
      %73 = vector.shape_cast %72 : vector<8x32xbf16> to vector<1x8x32xbf16>
      %74 = vector.extract_strided_slice %69 {offsets = [0, 0], sizes = [8, 32], strides = [1, 1]} : vector<8x128xbf16> to vector<8x32xbf16>
      %75 = vector.shape_cast %74 : vector<8x32xbf16> to vector<1x8x32xbf16>
      "tpu.trace_start"() <{level = 10 : i32, message = "bqd,bkd->bqk"}> : () -> ()
      %cst_36 = arith.constant dense<0.000000e+00> : vector<1x8x8xf32>
      %76 = tpu.matmul %71, %73, %cst_36 {dimension_numbers = #tpu.dot_dimension_numbers<[2], [2], [1], [1], [0, 0, 0, 1, 1, 1], [0], [0]>} : vector<1x8x32xbf16>, vector<1x8x32xbf16>, vector<1x8x8xf32> -> vector<1x8x8xf32>
      "tpu.trace_stop"() : () -> ()
      %cst_37 = arith.constant 0.176776692 : f32
      %77 = vector.broadcast %cst_37 : f32 to vector<1x8x8xf32>
      %78 = arith.mulf %76, %77 : vector<1x8x8xf32>
      %cst_38 = arith.constant dense<0xFF800000> : vector<1x8xf32>
      %79 = vector.multi_reduction <maximumf>, %78, %cst_38 [2] : vector<1x8x8xf32> to vector<1x8xf32>
      %80 = vector.shape_cast %79 : vector<1x8xf32> to vector<1x8x1xf32>
      %81 = vector.broadcast %80 : vector<1x8x1xf32> to vector<1x8x8xf32>
      %82 = arith.subf %78, %81 : vector<1x8x8xf32>
      %83 = math.exp %82 : vector<1x8x8xf32>
      %cst_39 = arith.constant dense<0.000000e+00> : vector<1x8xf32>
      %84 = vector.multi_reduction <add>, %83, %cst_39 [2] : vector<1x8x8xf32> to vector<1x8xf32>
      %85 = vector.shape_cast %84 : vector<1x8xf32> to vector<1x8x1xf32>
      %86 = tpu.reciprocal %85 {approx = true} : vector<1x8x1xf32> -> vector<1x8x1xf32>
      %87 = vector.broadcast %86 : vector<1x8x1xf32> to vector<1x8x8xf32>
      %88 = arith.mulf %83, %87 : vector<1x8x8xf32>
      %89 = arith.truncf %88 : vector<1x8x8xf32> to vector<1x8x8xbf16>
      "tpu.trace_start"() <{level = 10 : i32, message = "bqk,bkd->bqd"}> : () -> ()
      %cst_40 = arith.constant dense<0.000000e+00> : vector<1x8x32xf32>
      %90 = tpu.matmul %89, %75, %cst_40 {dimension_numbers = #tpu.dot_dimension_numbers<[2], [1], [1], [2], [0, 0, 0, 1, 1, 2], [0], [0]>} : vector<1x8x8xbf16>, vector<1x8x32xbf16>, vector<1x8x32xf32> -> vector<1x8x32xf32>
      "tpu.trace_stop"() : () -> ()
      %91 = vector.shape_cast %90 : vector<1x8x32xf32> to vector<8x32xf32>
      %92 = arith.truncf %91 : vector<8x32xf32> to vector<8x32xbf16>
      %93 = vector.extract_strided_slice %67 {offsets = [0, 32], sizes = [8, 32], strides = [1, 1]} : vector<8x128xbf16> to vector<8x32xbf16>
      %94 = vector.shape_cast %93 : vector<8x32xbf16> to vector<1x8x32xbf16>
      %95 = vector.extract_strided_slice %68 {offsets = [0, 32], sizes = [8, 32], strides = [1, 1]} : vector<8x128xbf16> to vector<8x32xbf16>
      %96 = vector.shape_cast %95 : vector<8x32xbf16> to vector<1x8x32xbf16>
      %97 = vector.extract_strided_slice %69 {offsets = [0, 32], sizes = [8, 32], strides = [1, 1]} : vector<8x128xbf16> to vector<8x32xbf16>
      %98 = vector.shape_cast %97 : vector<8x32xbf16> to vector<1x8x32xbf16>
      "tpu.trace_start"() <{level = 10 : i32, message = "bqd,bkd->bqk"}> : () -> ()
      %cst_41 = arith.constant dense<0.000000e+00> : vector<1x8x8xf32>
      %99 = tpu.matmul %94, %96, %cst_41 {dimension_numbers = #tpu.dot_dimension_numbers<[2], [2], [1], [1], [0, 0, 0, 1, 1, 1], [0], [0]>} : vector<1x8x32xbf16>, vector<1x8x32xbf16>, vector<1x8x8xf32> -> vector<1x8x8xf32>
      "tpu.trace_stop"() : () -> ()
      %cst_42 = arith.constant 0.176776692 : f32
      %100 = vector.broadcast %cst_42 : f32 to vector<1x8x8xf32>
      %101 = arith.mulf %99, %100 : vector<1x8x8xf32>
      %cst_43 = arith.constant dense<0xFF800000> : vector<1x8xf32>
      %102 = vector.multi_reduction <maximumf>, %101, %cst_43 [2] : vector<1x8x8xf32> to vector<1x8xf32>
      %103 = vector.shape_cast %102 : vector<1x8xf32> to vector<1x8x1xf32>
      %104 = vector.broadcast %103 : vector<1x8x1xf32> to vector<1x8x8xf32>
      %105 = arith.subf %101, %104 : vector<1x8x8xf32>
      %106 = math.exp %105 : vector<1x8x8xf32>
      %cst_44 = arith.constant dense<0.000000e+00> : vector<1x8xf32>
      %107 = vector.multi_reduction <add>, %106, %cst_44 [2] : vector<1x8x8xf32> to vector<1x8xf32>
      %108 = vector.shape_cast %107 : vector<1x8xf32> to vector<1x8x1xf32>
      %109 = tpu.reciprocal %108 {approx = true} : vector<1x8x1xf32> -> vector<1x8x1xf32>
      %110 = vector.broadcast %109 : vector<1x8x1xf32> to vector<1x8x8xf32>
      %111 = arith.mulf %106, %110 : vector<1x8x8xf32>
      %112 = arith.truncf %111 : vector<1x8x8xf32> to vector<1x8x8xbf16>
      "tpu.trace_start"() <{level = 10 : i32, message = "bqk,bkd->bqd"}> : () -> ()
      %cst_45 = arith.constant dense<0.000000e+00> : vector<1x8x32xf32>
      %113 = tpu.matmul %112, %98, %cst_45 {dimension_numbers = #tpu.dot_dimension_numbers<[2], [1], [1], [2], [0, 0, 0, 1, 1, 2], [0], [0]>} : vector<1x8x8xbf16>, vector<1x8x32xbf16>, vector<1x8x32xf32> -> vector<1x8x32xf32>
      "tpu.trace_stop"() : () -> ()
      %114 = vector.shape_cast %113 : vector<1x8x32xf32> to vector<8x32xf32>
      %115 = arith.truncf %114 : vector<8x32xf32> to vector<8x32xbf16>
      %116 = vector.extract_strided_slice %67 {offsets = [0, 64], sizes = [8, 32], strides = [1, 1]} : vector<8x128xbf16> to vector<8x32xbf16>
      %117 = vector.shape_cast %116 : vector<8x32xbf16> to vector<1x8x32xbf16>
      %118 = vector.extract_strided_slice %68 {offsets = [0, 64], sizes = [8, 32], strides = [1, 1]} : vector<8x128xbf16> to vector<8x32xbf16>
      %119 = vector.shape_cast %118 : vector<8x32xbf16> to vector<1x8x32xbf16>
      %120 = vector.extract_strided_slice %69 {offsets = [0, 64], sizes = [8, 32], strides = [1, 1]} : vector<8x128xbf16> to vector<8x32xbf16>
      %121 = vector.shape_cast %120 : vector<8x32xbf16> to vector<1x8x32xbf16>
      "tpu.trace_start"() <{level = 10 : i32, message = "bqd,bkd->bqk"}> : () -> ()
      %cst_46 = arith.constant dense<0.000000e+00> : vector<1x8x8xf32>
      %122 = tpu.matmul %117, %119, %cst_46 {dimension_numbers = #tpu.dot_dimension_numbers<[2], [2], [1], [1], [0, 0, 0, 1, 1, 1], [0], [0]>} : vector<1x8x32xbf16>, vector<1x8x32xbf16>, vector<1x8x8xf32> -> vector<1x8x8xf32>
      "tpu.trace_stop"() : () -> ()
      %cst_47 = arith.constant 0.176776692 : f32
      %123 = vector.broadcast %cst_47 : f32 to vector<1x8x8xf32>
      %124 = arith.mulf %122, %123 : vector<1x8x8xf32>
      %cst_48 = arith.constant dense<0xFF800000> : vector<1x8xf32>
      %125 = vector.multi_reduction <maximumf>, %124, %cst_48 [2] : vector<1x8x8xf32> to vector<1x8xf32>
      %126 = vector.shape_cast %125 : vector<1x8xf32> to vector<1x8x1xf32>
      %127 = vector.broadcast %126 : vector<1x8x1xf32> to vector<1x8x8xf32>
      %128 = arith.subf %124, %127 : vector<1x8x8xf32>
      %129 = math.exp %128 : vector<1x8x8xf32>
      %cst_49 = arith.constant dense<0.000000e+00> : vector<1x8xf32>
      %130 = vector.multi_reduction <add>, %129, %cst_49 [2] : vector<1x8x8xf32> to vector<1x8xf32>
      %131 = vector.shape_cast %130 : vector<1x8xf32> to vector<1x8x1xf32>
      %132 = tpu.reciprocal %131 {approx = true} : vector<1x8x1xf32> -> vector<1x8x1xf32>
      %133 = vector.broadcast %132 : vector<1x8x1xf32> to vector<1x8x8xf32>
      %134 = arith.mulf %129, %133 : vector<1x8x8xf32>
      %135 = arith.truncf %134 : vector<1x8x8xf32> to vector<1x8x8xbf16>
      "tpu.trace_start"() <{level = 10 : i32, message = "bqk,bkd->bqd"}> : () -> ()
      %cst_50 = arith.constant dense<0.000000e+00> : vector<1x8x32xf32>
      %136 = tpu.matmul %135, %121, %cst_50 {dimension_numbers = #tpu.dot_dimension_numbers<[2], [1], [1], [2], [0, 0, 0, 1, 1, 2], [0], [0]>} : vector<1x8x8xbf16>, vector<1x8x32xbf16>, vector<1x8x32xf32> -> vector<1x8x32xf32>
      "tpu.trace_stop"() : () -> ()
      %137 = vector.shape_cast %136 : vector<1x8x32xf32> to vector<8x32xf32>
      %138 = arith.truncf %137 : vector<8x32xf32> to vector<8x32xbf16>
      %139 = vector.extract_strided_slice %67 {offsets = [0, 96], sizes = [8, 32], strides = [1, 1]} : vector<8x128xbf16> to vector<8x32xbf16>
      %140 = vector.shape_cast %139 : vector<8x32xbf16> to vector<1x8x32xbf16>
      %141 = vector.extract_strided_slice %68 {offsets = [0, 96], sizes = [8, 32], strides = [1, 1]} : vector<8x128xbf16> to vector<8x32xbf16>
      %142 = vector.shape_cast %141 : vector<8x32xbf16> to vector<1x8x32xbf16>
      %143 = vector.extract_strided_slice %69 {offsets = [0, 96], sizes = [8, 32], strides = [1, 1]} : vector<8x128xbf16> to vector<8x32xbf16>
      %144 = vector.shape_cast %143 : vector<8x32xbf16> to vector<1x8x32xbf16>
      "tpu.trace_start"() <{level = 10 : i32, message = "bqd,bkd->bqk"}> : () -> ()
      %cst_51 = arith.constant dense<0.000000e+00> : vector<1x8x8xf32>
      %145 = tpu.matmul %140, %142, %cst_51 {dimension_numbers = #tpu.dot_dimension_numbers<[2], [2], [1], [1], [0, 0, 0, 1, 1, 1], [0], [0]>} : vector<1x8x32xbf16>, vector<1x8x32xbf16>, vector<1x8x8xf32> -> vector<1x8x8xf32>
      "tpu.trace_stop"() : () -> ()
      %cst_52 = arith.constant 0.176776692 : f32
      %146 = vector.broadcast %cst_52 : f32 to vector<1x8x8xf32>
      %147 = arith.mulf %145, %146 : vector<1x8x8xf32>
      %cst_53 = arith.constant dense<0xFF800000> : vector<1x8xf32>
      %148 = vector.multi_reduction <maximumf>, %147, %cst_53 [2] : vector<1x8x8xf32> to vector<1x8xf32>
      %149 = vector.shape_cast %148 : vector<1x8xf32> to vector<1x8x1xf32>
      %150 = vector.broadcast %149 : vector<1x8x1xf32> to vector<1x8x8xf32>
      %151 = arith.subf %147, %150 : vector<1x8x8xf32>
      %152 = math.exp %151 : vector<1x8x8xf32>
      %cst_54 = arith.constant dense<0.000000e+00> : vector<1x8xf32>
      %153 = vector.multi_reduction <add>, %152, %cst_54 [2] : vector<1x8x8xf32> to vector<1x8xf32>
      %154 = vector.shape_cast %153 : vector<1x8xf32> to vector<1x8x1xf32>
      %155 = tpu.reciprocal %154 {approx = true} : vector<1x8x1xf32> -> vector<1x8x1xf32>
      %156 = vector.broadcast %155 : vector<1x8x1xf32> to vector<1x8x8xf32>
      %157 = arith.mulf %152, %156 : vector<1x8x8xf32>
      %158 = arith.truncf %157 : vector<1x8x8xf32> to vector<1x8x8xbf16>
      "tpu.trace_start"() <{level = 10 : i32, message = "bqk,bkd->bqd"}> : () -> ()
      %cst_55 = arith.constant dense<0.000000e+00> : vector<1x8x32xf32>
      %159 = tpu.matmul %158, %144, %cst_55 {dimension_numbers = #tpu.dot_dimension_numbers<[2], [1], [1], [2], [0, 0, 0, 1, 1, 2], [0], [0]>} : vector<1x8x8xbf16>, vector<1x8x32xbf16>, vector<1x8x32xf32> -> vector<1x8x32xf32>
      "tpu.trace_stop"() : () -> ()
      %160 = vector.shape_cast %159 : vector<1x8x32xf32> to vector<8x32xf32>
      %161 = arith.truncf %160 : vector<8x32xf32> to vector<8x32xbf16>
      %162 = tpu.concatenate %92, %115, %138, %161 in 1 : vector<8x32xbf16>, vector<8x32xbf16>, vector<8x32xbf16>, vector<8x32xbf16> -> vector<8x128xbf16>
      %c0_56 = arith.constant 0 : index
      %c0_57 = arith.constant 0 : index
      %163 = vector.load %arg7[%c0_56, %c0_57] : memref<128x128xbf16, #tpu.memory_space<vmem>>, vector<128x128xbf16>
      %cst_58 = arith.constant dense<0.000000e+00> : vector<8x128xf32>
      %164 = tpu.matmul %162, %163, %cst_58 {dimension_numbers = #tpu.dot_dimension_numbers<[1], [0], [0], [1], [0, 0, 1, 1], [], []>} : vector<8x128xbf16>, vector<128x128xbf16>, vector<8x128xf32> -> vector<8x128xf32>
      %c0_59 = arith.constant 0 : index
      %c0_60 = arith.constant 0 : index
      %165 = vector.load %arg8[%c0_59, %c0_60] : memref<1x128xf32, #tpu.memory_space<vmem>>, vector<1x128xf32>
      %166 = vector.broadcast %165 : vector<1x128xf32> to vector<8x128xf32>
      %167 = arith.addf %164, %166 : vector<8x128xf32>
      %168 = arith.addf %38, %167 : vector<8x128xf32>
      %c0_61 = arith.constant 0 : index
      %c0_62 = arith.constant 0 : index
      %169 = vector.load %arg18[%c0_61, %c0_62] : memref<8x128xf32, #tpu.memory_space<vmem>>, vector<8x128xf32>
      tpu.vector_store %arg18[%c0_61, %c0_62], %168 {strides = array<i32>} : memref<8x128xf32, #tpu.memory_space<vmem>>, vector<8x128xf32>,
      %c0_63 = arith.constant 0 : index
      %c0_64 = arith.constant 0 : index
      %170 = vector.load %arg9[%c0_63, %c0_64] : memref<1x128xf32, #tpu.memory_space<vmem>>, vector<1x128xf32>
      %c0_65 = arith.constant 0 : index
      %c0_66 = arith.constant 0 : index
      %171 = vector.load %arg10[%c0_65, %c0_66] : memref<1x128xf32, #tpu.memory_space<vmem>>, vector<1x128xf32>
      %cst_67 = arith.constant dense<0.000000e+00> : vector<8xf32>
      %172 = vector.multi_reduction <add>, %168, %cst_67 [1] : vector<8x128xf32> to vector<8xf32>
      %173 = vector.shape_cast %172 : vector<8xf32> to vector<8x1xf32>
      %cst_68 = arith.constant 1.280000e+02 : f32
      %174 = vector.broadcast %cst_68 : f32 to vector<8x1xf32>
      %175 = arith.divf %173, %174 : vector<8x1xf32>
      %176 = vector.broadcast %175 : vector<8x1xf32> to vector<8x128xf32>
      %177 = arith.subf %168, %176 : vector<8x128xf32>
      %178 = arith.mulf %177, %177 : vector<8x128xf32>
      %cst_69 = arith.constant dense<0.000000e+00> : vector<8xf32>
      %179 = vector.multi_reduction <add>, %178, %cst_69 [1] : vector<8x128xf32> to vector<8xf32>
      %180 = vector.shape_cast %179 : vector<8xf32> to vector<8x1xf32>
      %cst_70 = arith.constant 1.280000e+02 : f32
      %181 = vector.broadcast %cst_70 : f32 to vector<8x1xf32>
      %182 = arith.divf %180, %181 : vector<8x1xf32>
      %183 = vector.broadcast %175 : vector<8x1xf32> to vector<8x128xf32>
      %184 = arith.subf %168, %183 : vector<8x128xf32>
      %cst_71 = arith.constant 9.99999974E-6 : f32
      %185 = vector.broadcast %cst_71 : f32 to vector<8x1xf32>
      %186 = arith.addf %182, %185 : vector<8x1xf32>
      %187 = math.rsqrt %186 : vector<8x1xf32>
      %188 = vector.broadcast %187 : vector<8x1xf32> to vector<8x128xf32>
      %189 = arith.mulf %184, %188 : vector<8x128xf32>
      %190 = vector.broadcast %170 : vector<1x128xf32> to vector<8x128xf32>
      %191 = arith.mulf %189, %190 : vector<8x128xf32>
      %192 = vector.broadcast %171 : vector<1x128xf32> to vector<8x128xf32>
      %193 = arith.addf %191, %192 : vector<8x128xf32>
      %194 = arith.truncf %193 : vector<8x128xf32> to vector<8x128xbf16>
      %c0_72 = arith.constant 0 : index
      %c0_73 = arith.constant 0 : index
      %195 = vector.load %arg19[%c0_72, %c0_73] : memref<8x128xbf16, #tpu.memory_space<vmem>>, vector<8x128xbf16>
      tpu.vector_store %arg19[%c0_72, %c0_73], %194 {strides = array<i32>} : memref<8x128xbf16, #tpu.memory_space<vmem>>, vector<8x128xbf16>,
    } else {
    }
    %c0 = arith.constant 0 : index
    %c0_1 = arith.constant 0 : index
    %3 = vector.load %arg19[%c0, %c0_1] : memref<8x128xbf16, #tpu.memory_space<vmem>>, vector<8x128xbf16>
    %c0_2 = arith.constant 0 : index
    %c0_3 = arith.constant 0 : index
    %4 = vector.load %arg11[%c0_2, %c0_3] : memref<128x512xbf16, #tpu.memory_space<vmem>>, vector<128x512xbf16>
    %cst = arith.constant dense<0.000000e+00> : vector<8x512xf32>
    %5 = tpu.matmul %3, %4, %cst {dimension_numbers = #tpu.dot_dimension_numbers<[1], [0], [0], [1], [0, 0, 1, 1], [], []>} : vector<8x128xbf16>, vector<128x512xbf16>, vector<8x512xf32> -> vector<8x512xf32>
    %c0_4 = arith.constant 0 : index
    %c0_5 = arith.constant 0 : index
    %6 = vector.load %arg12[%c0_4, %c0_5] : memref<1x512xf32, #tpu.memory_space<vmem>>, vector<1x512xf32>
    %7 = vector.broadcast %6 : vector<1x512xf32> to vector<8x512xf32>
    %8 = arith.addf %5, %7 : vector<8x512xf32>
    %9 = arith.mulf %8, %8 : vector<8x512xf32>
    %10 = arith.mulf %8, %9 : vector<8x512xf32>
    %cst_6 = arith.constant 4.471500e-02 : f32
    %11 = vector.broadcast %cst_6 : f32 to vector<8x512xf32>
    %12 = arith.mulf %11, %10 : vector<8x512xf32>
    %13 = arith.addf %8, %12 : vector<8x512xf32>
    %cst_7 = arith.constant 0.797884583 : f32
    %14 = vector.broadcast %cst_7 : f32 to vector<8x512xf32>
    %15 = arith.mulf %14, %13 : vector<8x512xf32>
    %16 = math.tanh %15 : vector<8x512xf32>
    %cst_8 = arith.constant 1.000000e+00 : f32
    %17 = vector.broadcast %cst_8 : f32 to vector<8x512xf32>
    %18 = arith.addf %17, %16 : vector<8x512xf32>
    %cst_9 = arith.constant 5.000000e-01 : f32
    %19 = vector.broadcast %cst_9 : f32 to vector<8x512xf32>
    %20 = arith.mulf %19, %18 : vector<8x512xf32>
    %21 = arith.mulf %8, %20 : vector<8x512xf32>
    %22 = arith.truncf %21 : vector<8x512xf32> to vector<8x512xbf16>
    %c0_10 = arith.constant 0 : index
    %c0_11 = arith.constant 0 : index
    %23 = vector.load %arg13[%c0_10, %c0_11] : memref<512x128xbf16, #tpu.memory_space<vmem>>, vector<512x128xbf16>
    %cst_12 = arith.constant dense<0.000000e+00> : vector<8x128xf32>
    %24 = tpu.matmul %22, %23, %cst_12 {dimension_numbers = #tpu.dot_dimension_numbers<[1], [0], [0], [1], [0, 0, 1, 1], [], []>} : vector<8x512xbf16>, vector<512x128xbf16>, vector<8x128xf32> -> vector<8x128xf32>
    %c0_i32_13 = arith.constant 0 : i32
    %25 = arith.cmpi eq, %arg1, %c0_i32_13 : i32
    %26 = arith.extui %25 : i1 to i32
    %c0_i32_14 = arith.constant 0 : i32
    %27 = arith.cmpi ne, %26, %c0_i32_14 : i32
    scf.if %27 {
      %c0_19 = arith.constant 0 : index
      %c0_20 = arith.constant 0 : index
      %34 = vector.load %arg20[%c0_19, %c0_20] : memref<8x128xf32, #tpu.memory_space<vmem>>, vector<8x128xf32>
      tpu.vector_store %arg20[%c0_19, %c0_20], %24 {strides = array<i32>} : memref<8x128xf32, #tpu.memory_space<vmem>>, vector<8x128xf32>,
    } else {
    }
    %c0_i32_15 = arith.constant 0 : i32
    %28 = arith.cmpi sgt, %arg1, %c0_i32_15 : i32
    %29 = arith.extui %28 : i1 to i32
    %c0_i32_16 = arith.constant 0 : i32
    %30 = arith.cmpi ne, %29, %c0_i32_16 : i32
    scf.if %30 {
      %c0_19 = arith.constant 0 : index
      %c0_20 = arith.constant 0 : index
      %34 = vector.load %arg20[%c0_19, %c0_20] : memref<8x128xf32, #tpu.memory_space<vmem>>, vector<8x128xf32>
      %35 = arith.addf %34, %24 : vector<8x128xf32>
      %c0_21 = arith.constant 0 : index
      %c0_22 = arith.constant 0 : index
      %36 = vector.load %arg20[%c0_21, %c0_22] : memref<8x128xf32, #tpu.memory_space<vmem>>, vector<8x128xf32>
      tpu.vector_store %arg20[%c0_21, %c0_22], %35 {strides = array<i32>} : memref<8x128xf32, #tpu.memory_space<vmem>>, vector<8x128xf32>,
    } else {
    }
    %c0_i32_17 = arith.constant 0 : i32
    %31 = arith.cmpi eq, %arg1, %c0_i32_17 : i32
    %32 = arith.extui %31 : i1 to i32
    %c0_i32_18 = arith.constant 0 : i32
    %33 = arith.cmpi ne, %32, %c0_i32_18 : i32
    scf.if %33 {
      %c0_19 = arith.constant 0 : index
      %c0_20 = arith.constant 0 : index
      %34 = vector.load %arg18[%c0_19, %c0_20] : memref<8x128xf32, #tpu.memory_space<vmem>>, vector<8x128xf32>
      %c0_21 = arith.constant 0 : index
      %c0_22 = arith.constant 0 : index
      %35 = vector.load %arg20[%c0_21, %c0_22] : memref<8x128xf32, #tpu.memory_space<vmem>>, vector<8x128xf32>
      %36 = arith.addf %34, %35 : vector<8x128xf32>
      %c0_23 = arith.constant 0 : index
      %c0_24 = arith.constant 0 : index
      %37 = vector.load %arg14[%c0_23, %c0_24] : memref<1x128xf32, #tpu.memory_space<vmem>>, vector<1x128xf32>
      %38 = vector.broadcast %37 : vector<1x128xf32> to vector<8x128xf32>
      %39 = arith.addf %36, %38 : vector<8x128xf32>
      %40 = vector.shape_cast %39 : vector<8x128xf32> to vector<1x8x128xf32>
      %c0_25 = arith.constant 0 : index
      %c0_26 = arith.constant 0 : index
      %c0_27 = arith.constant 0 : index
      %41 = vector.load %arg17[%c0_25, %c0_26, %c0_27] : memref<1x8x128xf32, #tpu.memory_space<vmem>>, vector<1x8x128xf32>
      tpu.vector_store %arg17[%c0_25, %c0_26, %c0_27], %40 {strides = array<i32>} : memref<1x8x128xf32, #tpu.memory_space<vmem>>, vector<1x8x128xf32>,
    } else {
    }
    return
  }
  func.func @transform_0(%arg0: i32, %arg1: i32) -> (i32, i32, i32) {
    %c0_i32 = arith.constant 0 : i32
    %c0_i32_0 = arith.constant 0 : i32
    %c0_i32_1 = arith.constant 0 : i32
    return %arg0, %c0_i32, %c0_i32_0 : i32, i32, i32
  }
  func.func @transform_1(%arg0: i32, %arg1: i32) -> (i32, i32) {
    %c0_i32 = arith.constant 0 : i32
    %c0_i32_0 = arith.constant 0 : i32
    %c0_i32_1 = arith.constant 0 : i32
    return %c0_i32, %c0_i32_0 : i32, i32
  }
  func.func @transform_2(%arg0: i32, %arg1: i32) -> (i32, i32) {
    %c0_i32 = arith.constant 0 : i32
    %c0_i32_0 = arith.constant 0 : i32
    %c0_i32_1 = arith.constant 0 : i32
    return %c0_i32, %c0_i32_0 : i32, i32
  }
  func.func @transform_3(%arg0: i32, %arg1: i32) -> (i32, i32) {
    %c0_i32 = arith.constant 0 : i32
    %c0_i32_0 = arith.constant 0 : i32
    %c0_i32_1 = arith.constant 0 : i32
    return %c0_i32, %c0_i32_0 : i32, i32
  }
  func.func @transform_4(%arg0: i32, %arg1: i32) -> (i32, i32) {
    %c0_i32 = arith.constant 0 : i32
    %c0_i32_0 = arith.constant 0 : i32
    %c0_i32_1 = arith.constant 0 : i32
    return %c0_i32, %c0_i32_0 : i32, i32
  }
  func.func @transform_5(%arg0: i32, %arg1: i32) -> (i32, i32) {
    %c0_i32 = arith.constant 0 : i32
    %c0_i32_0 = arith.constant 0 : i32
    %c0_i32_1 = arith.constant 0 : i32
    return %c0_i32, %c0_i32_0 : i32, i32
  }
  func.func @transform_6(%arg0: i32, %arg1: i32) -> (i32, i32) {
    %c0_i32 = arith.constant 0 : i32
    %c0_i32_0 = arith.constant 0 : i32
    %c0_i32_1 = arith.constant 0 : i32
    return %c0_i32, %c0_i32_0 : i32, i32
  }
  func.func @transform_7(%arg0: i32, %arg1: i32) -> (i32, i32) {
    %c0_i32 = arith.constant 0 : i32
    %c0_i32_0 = arith.constant 0 : i32
    %c0_i32_1 = arith.constant 0 : i32
    return %c0_i32, %c0_i32_0 : i32, i32
  }
  func.func @transform_8(%arg0: i32, %arg1: i32) -> (i32, i32) {
    %c0_i32 = arith.constant 0 : i32
    %c0_i32_0 = arith.constant 0 : i32
    %c0_i32_1 = arith.constant 0 : i32
    return %c0_i32, %c0_i32_0 : i32, i32
  }
  func.func @transform_9(%arg0: i32, %arg1: i32) -> (i32, i32) {
    %c0_i32 = arith.constant 0 : i32
    %c0_i32_0 = arith.constant 0 : i32
    return %c0_i32, %arg1 : i32, i32
  }
  func.func @transform_10(%arg0: i32, %arg1: i32) -> (i32, i32) {
    %c0_i32 = arith.constant 0 : i32
    %c0_i32_0 = arith.constant 0 : i32
    return %c0_i32, %arg1 : i32, i32
  }
  func.func @transform_11(%arg0: i32, %arg1: i32) -> (i32, i32) {
    %c0_i32 = arith.constant 0 : i32
    %c0_i32_0 = arith.constant 0 : i32
    return %arg1, %c0_i32 : i32, i32
  }
  func.func @transform_12(%arg0: i32, %arg1: i32) -> (i32, i32) {
    %c0_i32 = arith.constant 0 : i32
    %c0_i32_0 = arith.constant 0 : i32
    %c0_i32_1 = arith.constant 0 : i32
    return %c0_i32, %c0_i32_0 : i32, i32
  }
  func.func @transform_13(%arg0: i32, %arg1: i32) -> (i32, i32) {
    %c0_i32 = arith.constant 0 : i32
    %c0_i32_0 = arith.constant 0 : i32
    %c0_i32_1 = arith.constant 0 : i32
    return %c0_i32, %c0_i32_0 : i32, i32
  }
  func.func @transform_14(%arg0: i32, %arg1: i32) -> (i32, i32) {
    %c0_i32 = arith.constant 0 : i32
    %c0_i32_0 = arith.constant 0 : i32
    %c0_i32_1 = arith.constant 0 : i32
    return %c0_i32, %c0_i32_0 : i32, i32
  }
  func.func @transform_15(%arg0: i32, %arg1: i32) -> (i32, i32, i32) {
    %c0_i32 = arith.constant 0 : i32
    %c0_i32_0 = arith.constant 0 : i32
    %c0_i32_1 = arith.constant 0 : i32
    return %arg0, %c0_i32, %c0_i32_0 : i32, i32, i32
  }
}

</mosaic_0001>

<bundles_post_ra>
// kernel: tpu_custom_call.1
= control target key start
LH: loop header
LB: loop body
LE: loop exit
PB: predicated region body
PF: predicated region fallthrough
CT: control target
= control target key end

     0   :  { %s3763_s0 = inlined_call_operand.hbm [shape: f32[2,8,128], index: 0, kind: input, shape index: {}]   ;;  %s3764_s1 = inlined_call_operand.hbm [shape: f32[8,128], index: 1, kind: input, shape index: {}]   ;;  %s3765_s2 = inlined_call_operand.vmem [shape: f32[1,128], index: 2, kind: input, shape index: {}]   ;;  %s3766_s3 = inlined_call_operand.vmem [shape: f32[1,128], index: 3, kind: input, shape index: {}]   ;;  %s3767_s4 = inlined_call_operand.hbm [shape: bf16[128,384], index: 4, kind: input, shape index: {}]   ;;  %s3768_s5 = inlined_call_operand.hbm [shape: bf16[128,128], index: 5, kind: input, shape index: {}]   ;;  %s3769_s6 = inlined_call_operand.vmem [shape: f32[1,128], index: 6, kind: input, shape index: {}]   ;;  %s3770_s7 = inlined_call_operand.vmem [shape: f32[1,128], index: 7, kind: input, shape index: {}]   ;;  %s3771_s8 = inlined_call_operand.vmem [shape: f32[1,128], index: 8, kind: input, shape index: {}]   ;;  %s3772_s9 = inlined_call_operand.hbm [shape: bf16[128,512], index: 9, kind: input, shape index: {}]   ;;  %s3773_s10 = inlined_call_operand.vmem [shape: f32[1,512], index: 10, kind: input, shape index: {}]   ;;  %s3774_s11 = inlined_call_operand.hbm [shape: bf16[512,128], index: 11, kind: input, shape index: {}]   ;;  %s3775_s12 = inlined_call_operand.vmem [shape: f32[1,128], index: 12, kind: input, shape index: {}]   ;;  %s3776_s13 = inlined_call_operand.vmem [shape: f32[1,128], index: 13, kind: input, shape index: {}]   ;;  %s3777_s14 = inlined_call_operand.vmem [shape: f32[1,128], index: 14, kind: input, shape index: {}]   ;;  %s3778_s15 = inlined_call_operand.hbm [shape: f32[2,8,128], index: 15, kind: output, shape index: {}]  }
   0x1   :  { %3787 = sst [smem:[#allocation23_spill]] %s3764_s1 }
   0x2   :  { %3788 = sst [smem:[#allocation24_spill]] %s3767_s4 }
   0x3   :  { %3789 = sst [smem:[#allocation25_spill]] %s3768_s5 }
   0x4   :  { %3790 = sst [smem:[#allocation26_spill]] %s3771_s8 }
   0x5   :  { %3791 = sst [smem:[#allocation27_spill]] %s3773_s10 }
   0x6   :  { %3792 = sst [smem:[#allocation28_spill]] %s3775_s12 }
   0x7   :  { %3793 = sst [smem:[#allocation29_spill]] %s3778_s15 }
   0x8   :  { %20 = vsyncpa [#allocation6], 0 }
   0x9   :  { %22 = vsyncpa [#allocation6 + $0x1], 0 }
   0xa   :  { %23 = vsyncpa [#allocation9], 0 }
   0xb   :  { %24 = vsyncpa [#allocation12], 0 }
   0xc   :  { %25 = vsyncpa [#allocation15], 0 }
   0xd   :  { %26 = vsyncpa [#allocation7], 0 }
   0xe   :  { %28 = vsyncpa [#allocation7 + $0x1], 0  ;;  %s3313_s18 = smov 0   ;;  %s3315_s19 = smov 0  }
   0xf   :  { %s3317_s20 = smov 0   ;;  %s3319_s13 = smov 0  }
  0x10   :  { %s3321_s21 = smov 0   ;;  %s3323_s14 = smov 0  }
  0x11 LB: > { %3794 = sst [smem:[#allocation22_spill]] %s3204_s13  ;;  %s3779_s22 = sadd.s32 4294967295, %s3212_s14   ;;  %s3212_s14 = sphi %s3323_s14, %s34_s14   ;;  %s3208_s21 = sphi %s3321_s21, %s3825_s21   ;;  %s3204_s13 = sphi %s3319_s13, %s3824_s13   ;;  %s3200_s20 = sphi %s3317_s20, %s3823_s20   ;;  %s3196_s19 = sphi %s3315_s19, %s3822_s19   ;;  %s3192_s18 = sphi %s3313_s18, %s3821_s18  }
  0x12   : > { %p2377_p0 = scmp.ge.s32.totalorder %s3212_s14, 1  ;;  %p3347_p1 = scmp.eq.s32.totalorder %s3779_s22, 0 }
  0x13   : > { %p412_p2 = scmp.lt.s32.totalorder %s3212_s14, 3  ;;  %s3214_s25 = smov [#allocation8]  }
  0x14   : > { %s3795_s23 = scalar_select %p3347_p1, 1, 0 }
  0x15   : > { %p3352_p3 = pnand %p2377_p0, %p412_p2  ;;  %s425_s26 = sshll.u32 %s3214_s25, 4  ;;  %s426_s26 = int_to_ptr.vmem [resolvable:$true] %s425_s26 }
  0x16   : > { %s3215_s27 = smov [#allocation11]   ;;  %s3216_s30 = smov [#allocation10]  }
  0x17   : > { %s3796_s24 = scalar_select %p3352_p3, 1, 0 }
  0x18   : > { %p2699_p5 = pneg %p3352_p3  ;;  %s454_s28 = sshll.u32 %s3215_s27, 4  ;;  %s3365_s28 = int_to_ptr.vmem [resolvable:$true] %s454_s28 }
  0x19   : > { %s3367_s16 = sshll.u32 %s3216_s30, 4  ;;  %s3798_s1 = sld [smem:[#allocation23_spill]]  ;;  %s442_s16 = int_to_ptr.vmem [resolvable:$true] %s3367_s16 }
  0x1a   : > { %p3361_p6 = pnand %p2699_p5, %p3347_p1 }
  0x1c   : > { %p3377_p8 = pneg %p3361_p6 }
  0x1f   : > { %s2948_s25 = scalar_lea.hbm %s3798_s1, 128 }
  0x20   : > { %p2949_p7 = scmp.ne.s32.totalorder %s3798_s1, %s2948_s25  ;;  %p2955_p11 = scmp.lt.u32.totalorder %s2948_s25, %s3798_s1 }
  0x22   : > { %p2951_p9 = pnand %p3377_p8, %p2949_p7 }
  0x24   : > { %p2952_p10 = pneg %p2951_p9 }
  0x26   : > { %p2957_p12 = pnand %p2955_p11, %p2952_p10 }
  0x28   : > { %2960 = shalt.err (!%p2957_p12)
}
  0x29   : > { %s2961_s22 = scalar_lea.vmem %s426_s26, 128  ;;  %p2969_p5 = scmp.lt.s32.totalorder %s426_s26, %s426_s26 }
  0x2a   : > { %p2962_p13 = scmp.ne.s32.totalorder %s426_s26, %s2961_s22  ;;  %p2970_p4 = scmp.lt.s32.totalorder %s2961_s22, %s2961_s22 }
  0x2c   : > { %p2964_p0 = pnand %p2962_p13, %p3377_p8  ;;  %p2971_p3 = por %p2970_p4, %p2969_p5 }
  0x2e   : > { %p2965_p2 = pneg %p2964_p0 }
  0x30   : > { %p2972_p1 = pnand %p2971_p3, %p2965_p2 }
  0x32   : > { %2975 = shalt.err (!%p2972_p1)
}
  0x33   : > { %2702 = dma.hbm_to_vmem [thread:$0]  (!%p3361_p6), %s3798_s1, 128, %s426_s26, [#allocation9]  }
  0x34   : > { %s3800_s5 = sld [smem:[#allocation25_spill]] }
  0x3a   : > { %s2976_s25 = scalar_lea.hbm %s3800_s5, 1024 }
  0x3b   : > { %p2977_p7 = scmp.ne.s32.totalorder %s3800_s5, %s2976_s25  ;;  %p2983_p1 = scmp.lt.u32.totalorder %s2976_s25, %s3800_s5 }
  0x3d   : > { %p2979_p9 = pnand %p2977_p7, %p3377_p8 }
  0x3f   : > { %p2980_p4 = pneg %p2979_p9 }
  0x41   : > { %p2985_p3 = pnand %p2983_p1, %p2980_p4 }
  0x43   : > { %2988 = shalt.err (!%p2985_p3)
}
  0x44   : > { %s2989_s26 = scalar_lea.vmem %s3365_s28, 1024  ;;  %p2997_p13 = scmp.lt.s32.totalorder %s3365_s28, %s3365_s28 }
  0x45   : > { %p2990_p10 = scmp.ne.s32.totalorder %s3365_s28, %s2989_s26  ;;  %p2998_p0 = scmp.lt.s32.totalorder %s2989_s26, %s2989_s26 }
  0x47   : > { %p2992_p11 = pnand %p2990_p10, %p3377_p8  ;;  %p2999_p2 = por %p2998_p0, %p2997_p13 }
  0x49   : > { %p2993_p12 = pneg %p2992_p11 }
  0x4b   : > { %p3000_p5 = pnand %p2999_p2, %p2993_p12 }
  0x4d   : > { %3003 = shalt.err (!%p3000_p5)
}
  0x4e   : > { %s3784_s10 = smov 64   ;;  %s3785_s8 = smov 4  }
  0x4f   : > { %2708 = dma.hbm_to_vmem [thread:$0]  (!%p3361_p6), %s3800_s5, 1024, %s3365_s28, [#allocation12], %s3784_s10, %s3784_s10, %s3785_s8  }
  0x50   : > { %s3801_s4 = sld [smem:[#allocation24_spill]] }
  0x56   : > { %s3004_s25 = scalar_lea.hbm %s3801_s4, 3072 }
  0x57   : > { %p3005_p7 = scmp.ne.s32.totalorder %s3801_s4, %s3004_s25  ;;  %p3011_p1 = scmp.lt.u32.totalorder %s3004_s25, %s3801_s4 }
  0x59   : > { %p3007_p9 = pnand %p3005_p7, %p3377_p8 }
  0x5b   : > { %p3008_p4 = pneg %p3007_p9 }
  0x5d   : > { %p3013_p3 = pnand %p3011_p1, %p3008_p4 }
  0x5f   : > { %3016 = shalt.err (!%p3013_p3)
}
  0x60   : > { %s3017_s12 = scalar_lea.vmem %s442_s16, 3072  ;;  %p3025_p13 = scmp.lt.s32.totalorder %s442_s16, %s442_s16 }
  0x61   : > { %p3018_p10 = scmp.ne.s32.totalorder %s442_s16, %s3017_s12  ;;  %p3026_p0 = scmp.lt.s32.totalorder %s3017_s12, %s3017_s12 }
  0x63   : > { %p3020_p11 = pnand %p3018_p10, %p3377_p8  ;;  %p3027_p2 = por %p3026_p0, %p3025_p13 }
  0x65   : > { %p3021_p12 = pneg %p3020_p11 }
  0x67   : > { %p3028_p5 = pnand %p3027_p2, %p3021_p12 }
  0x69   : > { %3031 = shalt.err (!%p3028_p5)
}
  0x6a   : > { %s3219_s28 = smov 192   ;;  %s3220_s15 = smov 12  }
  0x6b   : > { %2705 = dma.hbm_to_vmem [thread:$0]  (!%p3361_p6), %s3801_s4, 3072, %s442_s16, [#allocation9], %s3219_s28, %s3219_s28, %s3220_s15  }
  0x6c   : > { %s3221_s17 = smov [#allocation13]   ;;  %s3032_s26 = scalar_lea.hbm %s3772_s9, 4096 }
  0x6d   : > { %s479_s25 = sshll.u32 %s3221_s17, 4  ;;  %p3033_p7 = scmp.ne.s32.totalorder %s3772_s9, %s3032_s26  ;;  %s480_s25 = int_to_ptr.vmem [resolvable:$true] %s479_s25 }
  0x6e   : > { %p3039_p1 = scmp.lt.u32.totalorder %s3032_s26, %s3772_s9 }
  0x6f   : > { %p3035_p9 = pnand %p3033_p7, %p3377_p8 }
  0x71   : > { %p3036_p4 = pneg %p3035_p9 }
  0x73   : > { %p3041_p3 = pnand %p3039_p1, %p3036_p4 }
  0x75   : > { %3044 = shalt.err (!%p3041_p3)
}
  0x76   : > { %s3045_s16 = scalar_lea.vmem %s480_s25, 4096  ;;  %p3053_p13 = scmp.lt.s32.totalorder %s480_s25, %s480_s25 }
  0x77   : > { %p3046_p10 = scmp.ne.s32.totalorder %s480_s25, %s3045_s16  ;;  %p3054_p0 = scmp.lt.s32.totalorder %s3045_s16, %s3045_s16 }
  0x79   : > { %p3048_p11 = pnand %p3046_p10, %p3377_p8  ;;  %p3055_p2 = por %p3054_p0, %p3053_p13 }
  0x7b   : > { %p3049_p12 = pneg %p3048_p11 }
  0x7d   : > { %p3056_p5 = pnand %p3055_p2, %p3049_p12 }
  0x7f   : > { %3059 = shalt.err (!%p3056_p5)
}
  0x80   : > { %s3222_s10 = smov 256   ;;  %s3223_s28 = smov 16  }
  0x81   : > { %2711 = dma.hbm_to_vmem [thread:$0]  (!%p3361_p6), %s3772_s9, 4096, %s480_s25, [#allocation12], %s3222_s10, %s3222_s10, %s3223_s28  }
  0x82   : > { %s3224_s15 = smov [#allocation14]   ;;  %s3060_s30 = scalar_lea.hbm %s3774_s11, 4096 }
  0x83   : > { %s503_s1 = sshll.u32 %s3224_s15, 4  ;;  %p3061_p7 = scmp.ne.s32.totalorder %s3774_s11, %s3060_s30  ;;  %s504_s1 = int_to_ptr.vmem [resolvable:$true] %s503_s1 }
  0x84   : > { %p3067_p1 = scmp.lt.u32.totalorder %s3060_s30, %s3774_s11 }
  0x85   : > { %p3063_p9 = pnand %p3061_p7, %p3377_p8 }
  0x87   : > { %p3064_p4 = pneg %p3063_p9 }
  0x89   : > { %p3069_p3 = pnand %p3067_p1, %p3064_p4 }
  0x8b   : > { %3072 = shalt.err (!%p3069_p3)
}
  0x8c   : > { %s3073_s25 = scalar_lea.vmem %s504_s1, 4096  ;;  %p3081_p13 = scmp.lt.s32.totalorder %s504_s1, %s504_s1 }
  0x8d   : > { %p3074_p10 = scmp.ne.s32.totalorder %s504_s1, %s3073_s25  ;;  %p3082_p0 = scmp.lt.s32.totalorder %s3073_s25, %s3073_s25 }
  0x8f   : > { %p3076_p11 = pnand %p3074_p10, %p3377_p8  ;;  %p3083_p2 = por %p3082_p0, %p3081_p13 }
  0x91   : > { %p3077_p12 = pneg %p3076_p11 }
  0x93   : > { %p3084_p5 = pnand %p3083_p2, %p3077_p12 }
  0x95   : > { %3087 = shalt.err (!%p3084_p5)
}
  0x96   : > { %s3802_s10 = smov 4   ;;  %s3803_s28 = smov 64  }
  0x97   : > { %2714 = dma.hbm_to_vmem [thread:$0]  (!%p3361_p6), %s3774_s11, 4096, %s504_s1, [#allocation15], %s3803_s28, %s3803_s28, %s3802_s10  }
  0x98   : > { %s2376_s29 = sadd.s32 4294967294, %s3212_s14   ;;  %s46_s27 = sadd.s32 1, %s3208_s21 }
  0x99   : > { %s53_s15 = sadd.s32 1, %s3200_s20  ;;  %p48_p8 = scmp.ge.s32.totalorder %s46_s27, 2 }
  0x9a   : > { %p60_p7 = scmp.ne.s32.totalorder %s3200_s20, %s3196_s19  ;;  %p61_p9 = scmp.eq.s32.totalorder %s3212_s14, 0 }
  0x9b   : > { %p66_p4 = scmp.ne.s32.totalorder %s3196_s19, %s3192_s18  ;;  %s3827_s27 = smov (%p48_p8, %s46_s27), 0 }
  0x9c   : > { %p3487_p1 = por %p61_p9, %p60_p7  ;;  %p3805_p3 = scmp.ne.s32.totalorder %s3795_s23, 0 }
  0x9d   : > { %s50_s17 = ssub.s32 %s3208_s21, %s3827_s27  ;;  %s3807_s30 = sadd.s32 4294967295, %s3212_s14  }
  0x9e   : > { %p3493_p6 = por %p3805_p3, %p66_p4  ;;  %p399_p10 = scmp.eq.s32.totalorder %s3807_s30, 1 }
  0x9f   : > { %p51_p11 = scmp.eq.s32.totalorder %s50_s17, 0  ;;  %p405_p12 = scmp.eq.s32.totalorder %s2376_s29, 1 }
  0xa0   : > { %p3501_p13 = por %p399_p10, %p60_p7  ;;  %p2728_p0 = scmp.lt.s32.totalorder %s3212_s14, 2 }
  0xa1   : > { %s3507_s26 = scalar_select %p51_p11, %s3200_s20, %s53_s15  }
  0xa2   : > { %s3808_s22 = scalar_select %p3501_p13, 1, 0 }
  0xa3   : > { %p3509_p2 = por %p405_p12, %p66_p4  ;;  %s526_s16 = sand.u32 1, %s3200_s20  }
  0xa4   : > { %s2385_s25 = sshll.u32 %s526_s16, 3  ;;  %s2386_s10 = sshll.u32 %s3208_s21, 7 }
  0xa5   : > { %s3809_s12 = scalar_select %p3509_p2, 1, 0 }
  0xa6   : > { %s3518_s8 = scalar_lea.hbm %s3763_s0, %s2386_s10  ;;  %s530_s29 = scalar_lea.vmem [#allocation5], %s2385_s25 }
  0xa7   : > { %s537_s17 = sshll.u32 %s530_s29, 4  ;;  %p3524_p5 = pnand %p2728_p0, %p3487_p1  ;;  %s3520_s17 = int_to_ptr.vmem [resolvable:$true] %s537_s17 }
  0xa8   : > { %s527_s30 = scalar_lea.sflag [#allocation6], %s526_s16  ;;  %s3088_s4 = scalar_lea.hbm %s3518_s8, 128 }
  0xa9   : > { %p3089_p8 = scmp.ne.s32.totalorder %s3518_s8, %s3088_s4  ;;  %p3090_p7 = pneg %p3524_p5 }
  0xaa   : > { %s3093_s28 = scalar_lea.hbm %s3763_s0, 256  ;;  %p3094_p1 = scmp.lt.u32.totalorder %s3518_s8, %s3763_s0 }
  0xab   : > { %p3091_p9 = pnand %p3090_p7, %p3089_p8  ;;  %p3095_p3 = scmp.lt.u32.totalorder %s3093_s28, %s3088_s4 }
  0xac   : > { %p3097_p11 = scmp.lt.u32.totalorder %s3088_s4, %s3518_s8 }
  0xad   : > { %p3092_p4 = pneg %p3091_p9  ;;  %p3096_p10 = por %p3095_p3, %p3094_p1 }
  0xaf   : > { %p3098_p12 = por %p3097_p11, %p3096_p10 }
  0xb1   : > { %p3099_p0 = pnand %p3098_p12, %p3092_p4 }
  0xb3   : > { %3102 = shalt.err (!%p3099_p0)
}
  0xb4   : > { %s3103_s16 = scalar_lea.vmem %s3520_s17, 128  ;;  %s3225_s29 = smov [#allocation5]  }
  0xb5   : > { %p3104_p8 = scmp.ne.s32.totalorder %s3520_s17, %s3103_s16  ;;  %s3108_s25 = sshll.u32 %s3225_s29, 4  ;;  %s3109_s25 = int_to_ptr.vmem [resolvable:$false] %s3108_s25 }
  0xb6   : > { %s3110_s10 = scalar_lea.vmem %s3109_s25, 256  ;;  %p3111_p13 = scmp.lt.s32.totalorder %s3520_s17, %s3109_s25 }
  0xb7   : > { %p3106_p9 = pnand %p3104_p8, %p3090_p7  ;;  %p3112_p1 = scmp.lt.s32.totalorder %s3110_s10, %s3103_s16 }
  0xb9   : > { %p3107_p2 = pneg %p3106_p9  ;;  %p3113_p3 = por %p3112_p1, %p3111_p13 }
  0xbb   : > { %p3114_p10 = pnand %p3113_p3, %p3107_p2 }
  0xbd   : > { %3117 = shalt.err (!%p3114_p10)
}
  0xbe   : > { %2718 = dma.hbm_to_vmem [thread:$0]  (!%p3524_p5), %s3518_s8, 128, %s3520_s17, %s527_s30  }
  0xbf   : > { %p3811_p4 = scmp.ne.s32.totalorder %s3796_s24, 0 }
  0xc0   : > { %s3556_s4 = sand.u32 (!%p3811_p4), 1, %s3196_s19  }
  0xc1   : > { %546 = sbr.rel (%p3811_p4) target bundleno = 3180 (0xc6c), region = 80  ;;  %s2388_s28 = sshll.u32 (!%p3811_p4), %s3556_s4, 3 }
  0xc2   : > { %s549_s13 = scalar_lea.sflag (!%p3811_p4), [#allocation6], %s3556_s4  ;;  %s552_s5 = scalar_lea.vmem (!%p3811_p4), [#allocation5], %s2388_s28 }
  0xc8   : > { %3171 = dma.done.wait (%p3493_p6), %s549_s13, 128  }
  0xc9   : > { %3173 = vsyncadd (%p3493_p6), %s549_s13, 4294967168  ;;  %p3812_p13 = scmp.ne.s32.totalorder %s3795_s23, 0 }
  0xcb   : > { %3175 = dma.done.wait (%p3812_p13), [#allocation9], 3200  }
  0xcc   : > { %3177 = vsyncadd (%p3812_p13), [#allocation9], 4294964096 }
  0xcd   : > { %3179 = dma.done.wait (%p3812_p13), [#allocation12], 5120  }
  0xce   : > { %3181 = vsyncadd (%p3812_p13), [#allocation12], 4294962176 }
  0xcf   : > { %3183 = dma.done.wait (%p3812_p13), [#allocation15], 4096  }
  0xd0   : > { %3185 = vsyncadd (%p3812_p13), [#allocation15], 4294963200  ;;  %v635_v0 = vld [vmem:[%s552_s5] sm:$0xff]  ;;  %v636_v1 = vld [vmem:[#allocation8] sm:$0xff]  ;;  %v3226_v5 = vmov 0.0   ;;  %v3227_v27 = vmov 0  }
  0xd1   : > { %v3578_v2 = vadd.f32 %v636_v1, %v635_v0  ;;  %v2800_v3 = vld [vmem:[#allocation10 + $0x4] ss:$12 sps:$4 sm:$0xff]   ;;  %v2802_v4 = vld [vmem:[#allocation10] ss:$12 sps:$4 sm:$0xff]   ;;  %2587 = vmatprep.subr.bf16.mxu1 %v3226_v5  ;;  %v2803_v6 = vld [vmem:[#allocation10 + $0x8] ss:$12 sps:$4 sm:$0xff]   ;;  %859 = vmatprep.mubr.bf16.mxu0 %v3227_v27 }
  0xd2   : > { %v2804_v7 = vld [vmem:[#allocation10 + $0x1c] ss:$12 sps:$4 sm:$0xff]   ;;  %v2806_v8 = vld [vmem:[#allocation10 + $0x18] ss:$12 sps:$4 sm:$0xff]   ;;  %827 = vmatprep.subr.bf16.mxu0 %v2800_v3  ;;  %v2807_v9 = vld [vmem:[#allocation10 + $0x20] ss:$12 sps:$4 sm:$0xff]   ;;  %2588 = vmatpush3.bf16.msra.mxu1 %v2803_v6 }
  0xd3   : > { %640 = vadd.xlane.f32.xlu0 %v3578_v2  ;;  %v2808_v10 = vld [vmem:[#allocation10 + $0x34] ss:$12 sps:$4 sm:$0xff]   ;;  %828 = vmatpush1.bf16.msra.mxu0 %v2802_v4  ;;  %v2810_v15 = vld [vmem:[#allocation10 + $0x30] ss:$12 sps:$4 sm:$0xff]   ;;  %v2811_v16 = vld [vmem:[#allocation10 + $0x38] ss:$12 sps:$4 sm:$0xff]  }
  0xd4   : > { %829 = vmatprep.subr.bf16.mxu0 %v2804_v7  ;;  %2589 = vmatprep.subr.bf16.mxu1 %v3226_v5  ;;  %v2812_v17 = vld [vmem:[#allocation10 + $0x4c] ss:$12 sps:$4 sm:$0xff]   ;;  %v2814_v18 = vld [vmem:[#allocation10 + $0x48] ss:$12 sps:$4 sm:$0xff]   ;;  %v2815_v19 = vld [vmem:[#allocation10 + $0x50] ss:$12 sps:$4 sm:$0xff]  }
  0xd5   : > { %v2816_v20 = vld [vmem:[#allocation10 + $0x64] ss:$12 sps:$4 sm:$0xff]   ;;  %v2818_v21 = vld [vmem:[#allocation10 + $0x60] ss:$12 sps:$4 sm:$0xff]   ;;  %v2819_v22 = vld [vmem:[#allocation10 + $0x68] ss:$12 sps:$4 sm:$0xff]  }
  0xd6   : > { %2590 = vmatpush3.bf16.msra.mxu1 %v2807_v9  ;;  %v2820_v23 = vld [vmem:[#allocation10 + $0x7c] ss:$12 sps:$4 sm:$0xff]   ;;  %v2822_v24 = vld [vmem:[#allocation10 + $0x78] ss:$12 sps:$4 sm:$0xff]   ;;  %v2823_v25 = vld [vmem:[#allocation10 + $0x80] ss:$12 sps:$4 sm:$0xff]  }
  0xd7   : > { %830 = vmatpush1.bf16.msra.mxu0 %v2806_v8  ;;  %2591 = vmatprep.subr.bf16.mxu1 %v3226_v5  ;;  %v2824_v26 = vld [vmem:[#allocation10 + $0x94] ss:$12 sps:$4 sm:$0xff]   ;;  %vm3228_vm0 = vmmov 0   ;;  %v2826_v28 = vld [vmem:[#allocation10 + $0x90] ss:$12 sps:$4 sm:$0xff]   ;;  %vm911_vm1 = vcmask 261120  }
  0xd8   : > { %831 = vmatprep.subr.bf16.mxu0 %v2808_v10  ;;  %2603 = vmatprep.mubr.msk.bf16.mxu1 %vm3228_vm0, %v3226_v5  ;;  %v2827_v29 = vld [vmem:[#allocation10 + $0x98] ss:$12 sps:$4 sm:$0xff]   ;;  %v2830_v31 = vld [vmem:[#allocation10 + $0xa8] ss:$12 sps:$4 sm:$0xff]   ;;  %v2831_v32 = vld [vmem:[#allocation10 + $0xb0] ss:$12 sps:$4 sm:$0xff]  }
  0xd9   : > { %v2828_v30 = vld [vmem:[#allocation10 + $0xac] ss:$12 sps:$4 sm:$0xff]   ;;  %v2395_v37 = vld [vmem:[%s3765_s2] ss:$0 sm:$0xff]  ;;  %s3229_s17 = smov 96   ;;  %s3230_s15 = smov 32  }
  0xda   : > { %2592 = vmatpush3.bf16.msra.mxu1 %v2811_v16  ;;  %v2396_v39 = vld [vmem:[%s3766_s3] ss:$0 sm:$0xff]  ;;  %vm975_vm2 = vcmask 1043456   ;;  %vm959_vm3 = vcmask 64512   ;;  %s3231_s30 = smov 64   ;;  %vm1371_vm4 = vcmask 523264  }
  0xdb   : > { %832 = vmatpush1.bf16.msra.mxu0 %v2810_v15  ;;  %2593 = vmatprep.subr.bf16.mxu1 %v3226_v5  ;;  %vm1374_vm5 = vcmask 785408   ;;  %s3813_s23 = sld [smem:[#allocation26_spill]]  ;;  %s3814_s8 = sld [smem:[#allocation27_spill]] }
  0xdc   : > { %833 = vmatprep.subr.bf16.mxu0 %v2812_v17  ;;  %s3816_s16 = sld [smem:[#allocation28_spill]]  ;;  %s622_s25 = scalar_lea.vmem [#allocation16], %s2388_s28 }
  0xdd   : > { %s2233_s10 = sshll.u32 %s622_s25, 4  ;;  %s2220_s1 = scalar_lea.sflag [#allocation7], %s3556_s4  ;;  %s3716_s10 = int_to_ptr.vmem [resolvable:$true] %s2233_s10 }
  0xde   : > { %2594 = vmatpush3.bf16.msra.mxu1 %v2815_v19  ;;  %p3818_p2 = scmp.ne.s32.totalorder %s3808_s22, 0  ;;  %s3232_s28 = smov [#allocation16]  }
  0xdf   : > { %834 = vmatpush1.bf16.msra.mxu0 %v2814_v18  ;;  %2595 = vmatprep.subr.bf16.mxu1 %v3226_v5 }
  0xe0   : > { %835 = vmatprep.subr.bf16.mxu0 %v2816_v20 }
  0xe2   : > { %2596 = vmatpush3.bf16.msra.mxu1 %v2819_v22 }
  0xe3   : > { %836 = vmatpush1.bf16.msra.mxu0 %v2818_v21  ;;  %2597 = vmatprep.subr.bf16.mxu1 %v3226_v5 }
  0xe4   : > { %837 = vmatprep.subr.bf16.mxu0 %v2820_v23 }
  0xe6   : > { %2598 = vmatpush3.bf16.msra.mxu1 %v2823_v25 }
  0xe7   : > { %838 = vmatpush1.bf16.msra.mxu0 %v2822_v24  ;;  %2599 = vmatprep.subr.bf16.mxu1 %v3226_v5 }
  0xe8   : > { %839 = vmatprep.subr.bf16.mxu0 %v2824_v26 }
  0xea   : > { %2600 = vmatpush3.bf16.msra.mxu1 %v2827_v29 }
  0xeb   : > { %840 = vmatpush1.bf16.msra.mxu0 %v2826_v28  ;;  %2601 = vmatprep.subr.bf16.mxu1 %v3226_v5 }
  0xec   : > { %841 = vmatprep.subr.bf16.mxu0 %v2828_v30 }
  0xee   : > { %2602 = vmatpush3.bf16.msra.mxu1 %v2831_v32 }
  0xef   : > { %842 = vmatpush1.bf16.msra.mxu0 %v2830_v31  ;;  %2607 = vmatprep.subr.bf16.mxu1 %v3226_v5 }
  0xf0   : > { %2631 = vmatprep.subr.bf16.mxu0 %v3226_v5 }
 0x160   : > { %v641_v11 = vpop.xlane.xlu0 %640 }
 0x161   : > { %v643_v12 = vmul.f32 0.0078125, %v641_v11 }
 0x163   : > { %v644_v13 = vsub.f32 %v3578_v2, %v643_v12 }
 0x165   : > { %v645_v14 = vmul.f32 %v644_v13, %v644_v13 }
 0x167   : > { %646 = vadd.xlane.f32.xlu0 %v645_v14 }
 0x1f4   : > { %v647_v33 = vpop.xlane.xlu0 %646 }
 0x1f5   : > { %v648_v34 = vmul.f32 0.0078125, %v647_v33 }
 0x1f7   : > { %v649_v35 = vadd.f32 1e-05, %v648_v34 }
 0x1f9   : > { %2920 = vrsqrt.f32 %v649_v35 }
 0x203   : > { %v2921_v36 = vpop.eup %2920 }
 0x204   : > { %v651_v38 = vmul.f32 %v2921_v36, %v644_v13 }
 0x206   : > { %v658_v40 = vmul.f32 %v2395_v37, %v651_v38 }
 0x208   : > { %v665_v41 = vadd.f32 %v2396_v39, %v658_v40 }
 0x20a   : > { %v666_v42 = vpack.c.bf16 %v665_v41, %v665_v41 }
 0x20c   : > { %860 = vmatmul.mubr.bf16.vlgmr.msra.gmra.mrb[0].mxu0 %v666_v42  ;;  %2604 = vmatmul.mubr.bf16.vlgmr.msra.gmra.mrb[0].mxu1 %v666_v42 }
 0x20d   : > { %2609 = vmatprep.mubr.msk.bf16.mxu1 %vm3228_vm0, %v3226_v5  ;;  %2633 = vmatprep.mubr.msk.bf16.mxu0 %vm3228_vm0, %v3226_v5 }
 0x2df   : > { %v861_v43 = vpop.f32.mrb[0].mxu0  ;;  %v902_v44 = vpop.f32.mrb[0].mxu1 }
 0x2e0   : > { %v863_v45 = vpop.f32.mrb[1].mxu0  ;;  %v2605_v46 = vpop.f32.mrb[1].mxu1  ;;  %v3608_v53 = vpack.c.bf16 %v902_v44, %v902_v44  ;;  %v908_v54 = vpack.c.bf16 %v861_v43, %v861_v43 }
 0x2e1   : > { %v909_v47 = vpack.c.bf16 %v863_v45, %v863_v45  ;;  %v865_v48 = vpop.f32.mrb[2].mxu0  ;;  %v905_v49 = vpop.f32.mrb[2].mxu1 }
 0x2e2   : > { %v866_v50 = vpop.f32.mrb[3].mxu0  ;;  %v2606_v51 = vpop.f32.mrb[3].mxu1  ;;  %v977_v55 = vsel %vm975_vm2, %v3608_v53, 0 }
 0x2e3   : > { %1024 = vrot.lane.b32.xlu0 %v909_v47, %s3229_s17  ;;  %v916_v52 = vsel %vm911_vm1, %v909_v47, 0 }
 0x2e4   : > { %2608 = vmatpush3.bf16.xpose.msra.mxu1 %v916_v52 }
 0x2e5   : > { %2613 = vmatprep.subr.bf16.mxu1 %v3226_v5 }
 0x2e7   : > { %1249 = vrot.lane.b32.xlu0 %v909_v47, %s3230_s15 }
 0x2eb   : > { %2610 = vmatmul.mubr.msk.bf16.vlgmr.msra.gmra.mrb[4].mxu1 %vm911_vm1, %v908_v54 }
 0x2ec   : > { %2614 = vmatpush3.bf16.msra.mxu1 %v977_v55  ;;  %2615 = vmatprep.mubr.msk.bf16.mxu1 %vm3228_vm0, %v3226_v5 }
 0x2ed   : > { %2619 = vmatprep.subr.bf16.mxu1 %v3226_v5 }
 0x355   : > { %v1025_v7 = vpop.permute.xlu0 %1024 }
 0x356   : > { %v1030_v14 = vsel %vm911_vm1, %v1025_v7, 0 }
 0x359   : > { %v1250_v12 = vpop.permute.xlu0 %1249 }
 0x35a   : > { %v1255_v16 = vsel %vm911_vm1, %v1250_v12, 0  ;;  %v2832_v12 = vld [vmem:[#allocation11] sm:$0xff]  }
 0x3be   : > { %v952_v56 = vpop.f32.mrb[4].mxu1 }
 0x3bf   : > { %v958_v57 = vmul.f32 0.17677669, %v952_v56  ;;  %v2611_v58 = vpop.f32.mrb[5].mxu1 }
 0x3c0   : > { %v955_v59 = vpop.f32.mrb[6].mxu1 }
 0x3c1   : > { %v2612_v60 = vpop.f32.mrb[7].mxu1  ;;  %v960_v61 = vsel %vm959_vm3, %v958_v57, -inf }
 0x3c2   : > { %961 = vmax.xlane.f32.xlu1 %v960_v61 }
 0x44f   : > { %v962_v62 = vpop.xlane.xlu1 %961 }
 0x450   : > { %v963_v63 = vsub.f32 %v958_v57, %v962_v62 }
 0x452   : > { %v964_v0 = vmul.f32 1.442695, %v963_v63 }
 0x454   : > { %2922 = vpow2.f32 %v964_v0 }
 0x45e   : > { %v2923_v1 = vpop.eup %2922 }
 0x45f   : > { %v966_v3 = vsel %vm959_vm3, %v2923_v1, 0.0 }
 0x460   : > { %967 = vadd.xlane.f32.xlu1 %v966_v3 }
 0x471   : > { %1021 = vrot.lane.b32.xlu1 %v908_v54, %s3229_s17 }
 0x475   : > { %1137 = vrot.lane.b32.xlu1 %v909_v47, %s3231_s30 }
 0x479   : > { %1135 = vrot.lane.b32.xlu1 %v908_v54, %s3231_s30 }
 0x47d   : > { %1247 = vrot.lane.b32.xlu1 %v908_v54, %s3230_s15 }
 0x4ed   : > { %v968_v4 = vpop.xlane.xlu1 %967 }
 0x4ee   : > { %2924 = vrcp.f32 %v968_v4 }
 0x4f1   : > { %v1022_v6 = vpop.permute.xlu1 %1021 }
 0x4f5   : > { %v1138_v8 = vpop.permute.xlu1 %1137 }
 0x4f6   : > { %v1143_v9 = vsel %vm911_vm1, %v1138_v8, 0 }
 0x4f7   : > { %2632 = vmatpush3.bf16.xpose.msra.mxu0 %v1143_v9 }
 0x4f8   : > { %v2925_v10 = vpop.eup %2924  ;;  %2643 = vmatprep.subr.bf16.mxu0 %v3226_v5 }
 0x4f9   : > { %v970_v11 = vmul.f32 %v2925_v10, %v2923_v1  ;;  %v1136_v15 = vpop.permute.xlu1 %1135 }
 0x4fb   : > { %v971_v13 = vpack.c.bf16 %v970_v11, %v970_v11 }
 0x4fd   : > { %2616 = vmatmul.mubr.msk.bf16.vlgmr.msra.gmra.mrb[8].mxu1 %vm959_vm3, %v971_v13  ;;  %v1248_v17 = vpop.permute.xlu1 %1247  ;;  %v2833_v13 = vld [vmem:[#allocation11 + $0x8] sm:$0xff]  }
 0x4fe   : > { %2620 = vmatpush3.bf16.xpose.msra.mxu1 %v1030_v14  ;;  %2634 = vmatmul.mubr.msk.bf16.vlgmr.msra.gmra.mrb[4].mxu0 %vm911_vm1, %v1136_v15  ;;  %v2834_v14 = vld [vmem:[#allocation11 + $0x10] sm:$0xff]   ;;  %v2835_v15 = vld [vmem:[#allocation11 + $0x18] sm:$0xff]  }
 0x4ff   : > { %2644 = vmatpush3.bf16.xpose.msra.mxu0 %v1255_v16  ;;  %2621 = vmatprep.mubr.msk.bf16.mxu1 %vm3228_vm0, %v3226_v5  ;;  %v2836_v16 = vld [vmem:[#allocation11 + $0x20] sm:$0xff]  }
 0x500   : > { %2645 = vmatprep.mubr.msk.bf16.mxu0 %vm3228_vm0, %v3226_v5  ;;  %2625 = vmatprep.subr.bf16.mxu1 %v3226_v5 }
 0x501   : > { %2655 = vmatprep.subr.bf16.mxu0 %v3226_v5 }
 0x505   : > { %2622 = vmatmul.mubr.msk.bf16.vlgmr.msra.gmra.mrb[12].mxu1 %vm911_vm1, %v1022_v6 }
 0x506   : > { %2646 = vmatmul.mubr.msk.bf16.vlgmr.msra.gmra.mrb[8].mxu0 %vm911_vm1, %v1248_v17  ;;  %2627 = vmatprep.mubr.msk.bf16.mxu1 %vm3228_vm0, %v3226_v5  ;;  %v2837_v17 = vld [vmem:[#allocation11 + $0x28] sm:$0xff]  }
 0x507   : > { %2671 = vmatprep.mubr.msk.bf16.mxu0 %vm3228_vm0, %v3226_v5  ;;  %2656 = vmatpush3.bf16.msra.mxu0 %v2832_v12  ;;  %v2873_v12 = vld [vmem:[#allocation13 + $0xa8] ss:$16 sps:$4 sm:$0xff]  }
 0x508   : > { %2657 = vmatprep.subr.bf16.mxu0 %v3226_v5 }
 0x50b   : > { %2658 = vmatpush3.bf16.msra.mxu0 %v2833_v13  ;;  %v2878_v13 = vld [vmem:[#allocation13 + $0xc4] ss:$16 sps:$4 sm:$0xff]  }
 0x50c   : > { %2659 = vmatprep.subr.bf16.mxu0 %v3226_v5 }
 0x50f   : > { %2660 = vmatpush3.bf16.msra.mxu0 %v2834_v14  ;;  %v2881_v14 = vld [vmem:[#allocation13 + $0xcc] ss:$16 sps:$4 sm:$0xff]  }
 0x510   : > { %2661 = vmatprep.subr.bf16.mxu0 %v3226_v5 }
 0x513   : > { %2662 = vmatpush3.bf16.msra.mxu0 %v2835_v15  ;;  %v2876_v15 = vld [vmem:[#allocation13 + $0xc0] ss:$16 sps:$4 sm:$0xff]  }
 0x514   : > { %2663 = vmatprep.subr.bf16.mxu0 %v3226_v5 }
 0x517   : > { %2664 = vmatpush3.bf16.msra.mxu0 %v2836_v16  ;;  %v2879_v16 = vld [vmem:[#allocation13 + $0xc8] ss:$16 sps:$4 sm:$0xff]  }
 0x518   : > { %2665 = vmatprep.subr.bf16.mxu0 %v3226_v5 }
 0x51b   : > { %2666 = vmatpush3.bf16.msra.mxu0 %v2837_v17  ;;  %v2884_v17 = vld [vmem:[#allocation13 + $0xe4] ss:$16 sps:$4 sm:$0xff]  }
 0x51c   : > { %2667 = vmatprep.subr.bf16.mxu0 %v3226_v5 }
 0x5d0   : > { %v3641_v18 = vpop.f32.mrb[8].mxu1 }
 0x5d1   : > { %v2617_v19 = vpop.f32.mrb[9].mxu1  ;;  %v1179_v20 = vpop.f32.mrb[4].mxu0 }
 0x5d2   : > { %v1185_v21 = vmul.f32 0.17677669, %v1179_v20  ;;  %v1016_v22 = vpop.f32.mrb[10].mxu1  ;;  %v2635_v23 = vpop.f32.mrb[5].mxu0  ;;  %v2838_v19 = vld [vmem:[#allocation11 + $0x30] sm:$0xff]  }
 0x5d3   : > { %v2618_v24 = vpop.f32.mrb[11].mxu1  ;;  %v1182_v25 = vpop.f32.mrb[6].mxu0  ;;  %2668 = vmatpush3.bf16.msra.mxu0 %v2838_v19  ;;  %v2887_v19 = vld [vmem:[#allocation13 + $0xec] ss:$16 sps:$4 sm:$0xff]  }
 0x5d4   : > { %v2636_v26 = vpop.f32.mrb[7].mxu0  ;;  %v1186_v28 = vsel %vm959_vm3, %v1185_v21, -inf  ;;  %2669 = vmatprep.subr.bf16.mxu0 %v3226_v5 }
 0x5d5   : > { %1187 = vmax.xlane.f32.xlu1 %v1186_v28 }
 0x5d8   : > { %v1066_v29 = vpop.f32.mrb[12].mxu1 }
 0x5d9   : > { %v1072_v30 = vmul.f32 0.17677669, %v1066_v29  ;;  %v2623_v31 = vpop.f32.mrb[13].mxu1  ;;  %v1291_v32 = vpop.f32.mrb[8].mxu0 }
 0x5da   : > { %v1069_v33 = vpop.f32.mrb[14].mxu1  ;;  %v2647_v34 = vpop.f32.mrb[9].mxu0  ;;  %v1297_v35 = vmul.f32 0.17677669, %v1291_v32 }
 0x5db   : > { %v2624_v36 = vpop.f32.mrb[15].mxu1  ;;  %v1294_v37 = vpop.f32.mrb[10].mxu0  ;;  %v1073_v38 = vsel %vm959_vm3, %v1072_v30, -inf }
 0x5dc   : > { %1074 = vmax.xlane.f32.xlu0 %v1073_v38  ;;  %v2648_v39 = vpop.f32.mrb[11].mxu0  ;;  %v1298_v40 = vsel %vm959_vm3, %v1297_v35, -inf  ;;  %v1019_v37 = vpack.c.bf16 %v3641_v18, %v3641_v18 }
 0x5e0   : > { %1299 = vmax.xlane.f32.xlu0 %v1298_v40 }
 0x662   : > { %v1188_v41 = vpop.xlane.xlu1 %1187 }
 0x663   : > { %v1189_v42 = vsub.f32 %v1185_v21, %v1188_v41  ;;  %v2839_v21 = vld [vmem:[#allocation11 + $0x38] sm:$0xff]  }
 0x664   : > { %2670 = vmatpush3.bf16.msra.mxu0 %v2839_v21  ;;  %v2885_v21 = vld [vmem:[#allocation13 + $0xe8] ss:$16 sps:$4 sm:$0xff]  }
 0x665   : > { %v1190_v43 = vmul.f32 1.442695, %v1189_v42 }
 0x667   : > { %2926 = vpow2.f32 %v1190_v43  ;;  %v2429_v43 = vld [vmem:[%s3769_s6] ss:$0 sm:$0xff] }
 0x669   : > { %v1075_v44 = vpop.xlane.xlu0 %1074 }
 0x66a   : > { %v1076_v45 = vsub.f32 %v1072_v30, %v1075_v44 }
 0x66c   : > { %v1077_v46 = vmul.f32 1.442695, %v1076_v45 }
 0x66d   : > { %v1300_v47 = vpop.xlane.xlu0 %1299 }
 0x66e   : > { %2928 = vpow2.f32 %v1077_v46  ;;  %v1301_v48 = vsub.f32 %v1297_v35, %v1300_v47 }
 0x670   : > { %v1302_v49 = vmul.f32 1.442695, %v1301_v48 }
 0x671   : > { %v2927_v50 = vpop.eup %2926 }
 0x672   : > { %2930 = vpow2.f32 %v1302_v49  ;;  %v1192_v51 = vsel %vm959_vm3, %v2927_v50, 0.0  ;;  %v2840_v49 = vld [vmem:[#allocation13] ss:$16 sps:$4 sm:$0xff]  }
 0x673   : > { %1193 = vadd.xlane.f32.xlu0 %v1192_v51  ;;  %v2843_v51 = vld [vmem:[#allocation13 + $0x8] ss:$16 sps:$4 sm:$0xff]  }
 0x678   : > { %v2929_v52 = vpop.eup %2928 }
 0x679   : > { %v1079_v54 = vsel %vm959_vm3, %v2929_v52, 0.0 }
 0x67a   : > { %1080 = vadd.xlane.f32.xlu0 %v1079_v54 }
 0x67c   : > { %v2931_v55 = vpop.eup %2930 }
 0x67d   : > { %v1304_v56 = vsel %vm959_vm3, %v2931_v55, 0.0 }
 0x67e   : > { %1305 = vadd.xlane.f32.xlu1 %v1304_v56  ;;  %v2848_v56 = vld [vmem:[#allocation13 + $0x24] ss:$16 sps:$4 sm:$0xff]  }
 0x68f   : > { %1198 = vrot.lane.b32.xlu1 %v3608_v53, %s3231_s30 }
 0x690   : > { %1086 = vrot.lane.b32.xlu0 %v3608_v53, %s3229_s17 }
 0x693   : > { %1310 = vrot.lane.b32.xlu1 %v3608_v53, %s3230_s15 }
 0x700   : > { %v1194_v57 = vpop.xlane.xlu0 %1193 }
 0x707   : > { %v1081_v58 = vpop.xlane.xlu0 %1080 }
 0x708   : > { %2932 = vrcp.f32 %v1081_v58  ;;  %v2846_v58 = vld [vmem:[#allocation13 + $0x20] ss:$16 sps:$4 sm:$0xff]  }
 0x709   : > { %2934 = vrcp.f32 %v1194_v57  ;;  %v2851_v57 = vld [vmem:[#allocation13 + $0x2c] ss:$16 sps:$4 sm:$0xff]  }
 0x70b   : > { %v1087_v59 = vpop.permute.xlu0 %1086  ;;  %v1306_v61 = vpop.xlane.xlu1 %1305 }
 0x70c   : > { %v1092_v60 = vsel %vm975_vm2, %v1087_v59, 0  ;;  %2936 = vrcp.f32 %v1306_v61  ;;  %v2849_v59 = vld [vmem:[#allocation13 + $0x28] ss:$16 sps:$4 sm:$0xff]   ;;  %v2857_v61 = vld [vmem:[#allocation13 + $0x4c] ss:$16 sps:$4 sm:$0xff]  }
 0x70d   : > { %2626 = vmatpush3.bf16.msra.mxu1 %v1092_v60  ;;  %v2854_v60 = vld [vmem:[#allocation13 + $0x44] ss:$16 sps:$4 sm:$0xff]  }
 0x70e   : > { %2637 = vmatprep.subr.bf16.mxu1 %v3226_v5 }
 0x70f   : > { %v1199_v0 = vpop.permute.xlu1 %1198 }
 0x710   : > { %v1204_v4 = vsel %vm975_vm2, %v1199_v0, 0  ;;  %v2860_v0 = vld [vmem:[#allocation13 + $0x64] ss:$16 sps:$4 sm:$0xff]  }
 0x712   : > { %v2933_v62 = vpop.eup %2932 }
 0x713   : > { %v1083_v63 = vmul.f32 %v2933_v62, %v2929_v52  ;;  %v2935_v3 = vpop.eup %2934  ;;  %v1311_v6 = vpop.permute.xlu1 %1310  ;;  %v2845_v52 = vld [vmem:[#allocation13 + $0xc] ss:$16 sps:$4 sm:$0xff]   ;;  %v2852_v62 = vld [vmem:[#allocation13 + $0x40] ss:$16 sps:$4 sm:$0xff]  }
 0x714   : > { %v1196_v53 = vmul.f32 %v2935_v3, %v2927_v50  ;;  %v1316_v9 = vsel %vm975_vm2, %v1311_v6, 0  ;;  %v2842_v50 = vld [vmem:[#allocation13 + $0x4] ss:$16 sps:$4 sm:$0xff]   ;;  %1776 = vmatprep.subr.bf16.mxu0 %v2845_v52  ;;  %v2858_v3 = vld [vmem:[#allocation13 + $0x60] ss:$16 sps:$4 sm:$0xff]  }
 0x715   : > { %v1084_v1 = vpack.c.bf16 %v1083_v63, %v1083_v63  ;;  %v2855_v63 = vld [vmem:[#allocation13 + $0x48] ss:$16 sps:$4 sm:$0xff]   ;;  %v2869_v6 = vld [vmem:[#allocation13 + $0x8c] ss:$16 sps:$4 sm:$0xff]   ;;  %v2907_v52 = vld [vmem:[#allocation14 + $0xa0] sm:$0xff]  }
 0x716   : > { %v1197_v7 = vpack.c.bf16 %v1196_v53, %v1196_v53  ;;  %v2937_v8 = vpop.eup %2936  ;;  %v2866_v53 = vld [vmem:[#allocation13 + $0x84] ss:$16 sps:$4 sm:$0xff]  }
 0x717   : > { %2628 = vmatmul.mubr.msk.bf16.vlgmr.msra.gmra.mrb[16].mxu1 %vm959_vm3, %v1084_v1  ;;  %v1308_v10 = vmul.f32 %v2937_v8, %v2931_v55  ;;  %v2863_v1 = vld [vmem:[#allocation13 + $0x6c] ss:$16 sps:$4 sm:$0xff]   ;;  %v2867_v8 = vld [vmem:[#allocation13 + $0x88] ss:$16 sps:$4 sm:$0xff]  }
 0x718   : > { %2638 = vmatpush3.bf16.msra.mxu1 %v1204_v4  ;;  %2639 = vmatprep.mubr.msk.bf16.mxu1 %vm3228_vm0, %v3226_v5  ;;  %v2861_v4 = vld [vmem:[#allocation13 + $0x68] ss:$16 sps:$4 sm:$0xff]  }
 0x719   : > { %2649 = vmatprep.subr.bf16.mxu1 %v3226_v5  ;;  %v1309_v11 = vpack.c.bf16 %v1308_v10, %v1308_v10  ;;  %v2875_v10 = vld [vmem:[#allocation13 + $0xac] ss:$16 sps:$4 sm:$0xff]  }
 0x71f   : > { %2640 = vmatmul.mubr.msk.bf16.vlgmr.msra.gmra.mrb[20].mxu1 %vm959_vm3, %v1197_v7  ;;  %v2864_v7 = vld [vmem:[#allocation13 + $0x80] ss:$16 sps:$4 sm:$0xff]  }
 0x720   : > { %2650 = vmatpush3.bf16.msra.mxu1 %v1316_v9  ;;  %2651 = vmatprep.mubr.msk.bf16.mxu1 %vm3228_vm0, %v3226_v5  ;;  %v2872_v9 = vld [vmem:[#allocation13 + $0xa4] ss:$16 sps:$4 sm:$0xff]  }
 0x721   : > { %1735 = vmatprep.subr.bf16.mxu1 %v2842_v50  ;;  %v2905_v50 = vld [vmem:[#allocation14 + $0xe0] sm:$0xff]  }
 0x727   : > { %2652 = vmatmul.mubr.msk.bf16.vlgmr.msra.gmra.mrb[24].mxu1 %vm959_vm3, %v1309_v11  ;;  %v2870_v11 = vld [vmem:[#allocation13 + $0xa0] ss:$16 sps:$4 sm:$0xff]  }
 0x728   : > { %1767 = vmatprep.mubr.bf16.mxu1 %v3227_v27  ;;  %1736 = vmatpush1.bf16.msra.mxu1 %v2840_v49  ;;  %v2904_v49 = vld [vmem:[#allocation14 + $0x60] sm:$0xff]  }
 0x729   : > { %1737 = vmatprep.subr.bf16.mxu1 %v2848_v56  ;;  %v2912_v56 = vld [vmem:[#allocation14 + $0x70] sm:$0xff]  }
 0x72c   : > { %1738 = vmatpush1.bf16.msra.mxu1 %v2846_v58  ;;  %v2914_v58 = vld [vmem:[#allocation14 + $0x30] sm:$0xff]  }
 0x72d   : > { %1739 = vmatprep.subr.bf16.mxu1 %v2854_v60  ;;  %v2916_v60 = vld [vmem:[#allocation14 + $0x78] sm:$0xff]  }
 0x730   : > { %1740 = vmatpush1.bf16.msra.mxu1 %v2852_v62  ;;  %v2918_v62 = vld [vmem:[#allocation14 + $0x38] sm:$0xff]  }
 0x731   : > { %1741 = vmatprep.subr.bf16.mxu1 %v2860_v0  ;;  %v1555_v0 = vlaneseq }
 0x734   : > { %1742 = vmatpush1.bf16.msra.mxu1 %v2858_v3 }
 0x735   : > { %1743 = vmatprep.subr.bf16.mxu1 %v2866_v53  ;;  %v1553_v53 = vld [vmem:[%s3814_s8] sm:$0xf]  ;;  %s3118_s8 = scalar_lea.vmem %s3716_s10, 128 }
 0x736   : > { %p3119_p6 = scmp.ne.s32.totalorder %s3716_s10, %s3118_s8 }
 0x738   : > { %1744 = vmatpush1.bf16.msra.mxu1 %v2864_v7  ;;  %p3120_p5 = pnand %p3119_p6, %p3818_p2 }
 0x739   : > { %1745 = vmatprep.subr.bf16.mxu1 %v2872_v9 }
 0x73a   : > { %p3121_p7 = pneg %p3120_p5 }
 0x73c   : > { %1746 = vmatpush1.bf16.msra.mxu1 %v2870_v11 }
 0x73d   : > { %1747 = vmatprep.subr.bf16.mxu1 %v2878_v13 }
 0x740   : > { %1748 = vmatpush1.bf16.msra.mxu1 %v2876_v15 }
 0x741   : > { %1749 = vmatprep.subr.bf16.mxu1 %v2884_v17 }
 0x7ea   : > { %v1128_v20 = vpop.f32.mrb[16].mxu1 }
 0x7eb   : > { %v1134_v22 = vpack.c.bf16 %v1128_v20, %v1128_v20  ;;  %v2629_v23 = vpop.f32.mrb[17].mxu1  ;;  %v2882_v20 = vld [vmem:[#allocation13 + $0xe0] ss:$16 sps:$4 sm:$0xff]  }
 0x7ec   : > { %v1131_v24 = vpop.f32.mrb[18].mxu1  ;;  %1750 = vmatpush1.bf16.msra.mxu1 %v2882_v20 }
 0x7ed   : > { %1360 = vrot.lane.b32.xlu1 %v1134_v22, %s3230_s15  ;;  %v2630_v25 = vpop.f32.mrb[19].mxu1 }
 0x7f2   : > { %v1240_v26 = vpop.f32.mrb[20].mxu1 }
 0x7f3   : > { %v1246_v28 = vpack.c.bf16 %v1240_v26, %v1240_v26  ;;  %v2641_v29 = vpop.f32.mrb[21].mxu1  ;;  %v2438_v26 = vld [vmem:[%s3770_s7] ss:$0 sm:$0xff] }
 0x7f4   : > { %v1243_v30 = vpop.f32.mrb[22].mxu1  ;;  %v2439_v29 = vld [vmem:[%s3813_s23] ss:$0 sm:$0xff]  ;;  %s3817_s23 = sld [smem:[#allocation29_spill]] }
 0x7f5   : > { %1363 = vrot.lane.b32.xlu0 %v1246_v28, %s3231_s30  ;;  %v2642_v31 = vpop.f32.mrb[23].mxu1 }
 0x7fa   : > { %v1352_v32 = vpop.f32.mrb[24].mxu1 }
 0x7fb   : > { %v1358_v33 = vpack.c.bf16 %v1352_v32, %v1352_v32  ;;  %v2653_v34 = vpop.f32.mrb[25].mxu1 }
 0x7fc   : > { %v1355_v35 = vpop.f32.mrb[26].mxu1  ;;  %v2888_v34 = vld [vmem:[#allocation14 + $0x40] sm:$0xff]  }
 0x7fd   : > { %1366 = vrot.lane.b32.xlu1 %v1358_v33, %s3229_s17  ;;  %v2654_v36 = vpop.f32.mrb[27].mxu1  ;;  %v2889_v35 = vld [vmem:[#allocation14 + $0xc0] sm:$0xff]   ;;  %2543 = vmatprep.subr.bf16.mxu1 %v2888_v34  ;;  %s3815_s17 = sld [smem:[#allocation22_spill]] }
 0x7fe   : > { %v2890_v36 = vld [vmem:[#allocation14] sm:$0xff]  }
 0x803   : > { %s2506_s29 = sshll.u32 %s3815_s17, 7  ;;  %s3122_s17 = sshll.u32 %s3232_s28, 4  ;;  %s3123_s17 = int_to_ptr.vmem [resolvable:$false] %s3122_s17 }
 0x804   : > { %s3714_s24 = scalar_lea.hbm %s3817_s23, %s2506_s29  ;;  %s3124_s15 = scalar_lea.vmem %s3123_s17, 256 }
 0x805   : > { %p3125_p11 = scmp.lt.s32.totalorder %s3716_s10, %s3123_s17  ;;  %p3126_p12 = scmp.lt.s32.totalorder %s3124_s15, %s3118_s8 }
 0x807   : > { %p3127_p0 = por %p3126_p12, %p3125_p11 }
 0x809   : > { %p3128_p8 = pnand %p3127_p0, %p3121_p7 }
 0x85f   : > { %v1361_v5 = vpop.permute.xlu1 %1360 }
 0x860   : > { %v1370_v39 = vsel %vm911_vm1, %v1019_v37, %v1361_v5  ;;  %v2891_v5 = vld [vmem:[#allocation14 + $0x80] sm:$0xff]   ;;  %v2892_v37 = vld [vmem:[#allocation14 + $0x48] sm:$0xff]  }
 0x867   : > { %v1364_v38 = vpop.permute.xlu0 %1363 }
 0x868   : > { %v1373_v40 = vsel %vm1371_vm4, %v1370_v39, %v1364_v38  ;;  %v2893_v38 = vld [vmem:[#allocation14 + $0xc8] sm:$0xff]  }
 0x869   : > { %v2894_v39 = vld [vmem:[#allocation14 + $0x8] sm:$0xff]  }
 0x86f   : > { %v1367_v41 = vpop.permute.xlu1 %1366 }
 0x870   : > { %v1376_v42 = vsel %vm1374_vm5, %v1373_v40, %v1367_v41  ;;  %v2895_v40 = vld [vmem:[#allocation14 + $0x88] sm:$0xff]   ;;  %v2896_v41 = vld [vmem:[#allocation14 + $0x50] sm:$0xff]  }
 0x871   : > { %2672 = vmatmul.mubr.bf16.vlgmr.msra.gmra.mrb[12].mxu0 %v1376_v42  ;;  %v2897_v42 = vld [vmem:[#allocation14 + $0xd0] sm:$0xff]  }
 0x872   : > { %1808 = vmatprep.mubr.bf16.mxu0 %v3227_v27  ;;  %1777 = vmatpush1.bf16.msra.mxu0 %v2843_v51  ;;  %v2906_v51 = vld [vmem:[#allocation14 + $0x20] sm:$0xff]  }
 0x873   : > { %1778 = vmatprep.subr.bf16.mxu0 %v2851_v57  ;;  %v2913_v57 = vld [vmem:[#allocation14 + $0xf0] sm:$0xff]  }
 0x876   : > { %1779 = vmatpush1.bf16.msra.mxu0 %v2849_v59  ;;  %v2915_v59 = vld [vmem:[#allocation14 + $0xb0] sm:$0xff]  }
 0x877   : > { %1780 = vmatprep.subr.bf16.mxu0 %v2857_v61  ;;  %v2917_v61 = vld [vmem:[#allocation14 + $0xf8] sm:$0xff]  }
 0x87a   : > { %1781 = vmatpush1.bf16.msra.mxu0 %v2855_v63  ;;  %v2919_v63 = vld [vmem:[#allocation14 + $0xb8] sm:$0xff]  }
 0x87b   : > { %1782 = vmatprep.subr.bf16.mxu0 %v2863_v1  ;;  %v1556_v1 = vshrl.u32 %v1555_v0, 7 }
 0x87d   : > { %v1557_v3 = vsub.s32 0, %v1556_v1  ;;  %v1569_v7 = vsub.s32 3, %v1556_v1 }
 0x87e   : > { %1783 = vmatpush1.bf16.msra.mxu0 %v2861_v4  ;;  %v1565_v4 = vsub.s32 2, %v1556_v1 }
 0x87f   : > { %1784 = vmatprep.subr.bf16.mxu0 %v2869_v6  ;;  %v1561_v6 = vsub.s32 1, %v1556_v1  ;;  %v1570_v11 = vrot.slane %v1553_v53, %v1569_v7 }
 0x880   : > { %v1566_v9 = vrot.slane %v1553_v53, %v1565_v4 }
 0x882   : > { %1785 = vmatpush1.bf16.msra.mxu0 %v2867_v8  ;;  %v1558_v8 = vrot.slane %v1553_v53, %v1557_v3 }
 0x883   : > { %1786 = vmatprep.subr.bf16.mxu0 %v2875_v10  ;;  %v1562_v10 = vrot.slane %v1553_v53, %v1561_v6 }
 0x886   : > { %1787 = vmatpush1.bf16.msra.mxu0 %v2873_v12 }
 0x887   : > { %1788 = vmatprep.subr.bf16.mxu0 %v2881_v14 }
 0x88a   : > { %1789 = vmatpush1.bf16.msra.mxu0 %v2879_v16 }
 0x88b   : > { %1790 = vmatprep.subr.bf16.mxu0 %v2887_v19 }
 0x88e   : > { %1791 = vmatpush1.bf16.msra.mxu0 %v2885_v21 }
 0x88f   : > { %2565 = vmatprep.subr.bf16.mxu0 %v2889_v35 }
 0x944   : > { %v1483_v44 = vpop.f32.mrb[12].mxu0 }
 0x945   : > { %v1484_v45 = vadd.f32 %v2429_v43, %v1483_v44  ;;  %v2673_v46 = vpop.f32.mrb[13].mxu0  ;;  %v2898_v43 = vld [vmem:[#allocation14 + $0x10] sm:$0xff]  }
 0x946   : > { %v1486_v47 = vpop.f32.mrb[14].mxu0  ;;  %v2899_v44 = vld [vmem:[#allocation14 + $0x90] sm:$0xff]   ;;  %v2901_v46 = vld [vmem:[#allocation14 + $0xd8] sm:$0xff]  }
 0x947   : > { %v3686_v18 = vadd.f32 %v1484_v45, %v3578_v2  ;;  %v2674_v48 = vpop.f32.mrb[15].mxu0  ;;  %v2900_v45 = vld [vmem:[#allocation14 + $0x58] sm:$0xff]  }
 0x948   : > { %v2902_v47 = vld [vmem:[#allocation14 + $0x18] sm:$0xff]  }
 0x949   : > { %1493 = vadd.xlane.f32.xlu0 %v3686_v18  ;;  %v2903_v48 = vld [vmem:[#allocation14 + $0x98] sm:$0xff]  }
 0x9d6   : > { %v1494_v27 = vpop.xlane.xlu0 %1493 }
 0x9d7   : > { %v1495_v54 = vmul.f32 0.0078125, %v1494_v27  ;;  %v2908_v27 = vld [vmem:[#allocation14 + $0x68] sm:$0xff]  }
 0x9d9   : > { %v3690_v55 = vsub.f32 %v3686_v18, %v1495_v54  ;;  %v2909_v54 = vld [vmem:[#allocation14 + $0xe8] sm:$0xff]  }
 0x9db   : > { %v1497_v2 = vmul.f32 %v3690_v55, %v3690_v55 }
 0x9dd   : > { %1498 = vadd.xlane.f32.xlu1 %v1497_v2  ;;  %v2911_v2 = vld [vmem:[#allocation14 + $0xa8] sm:$0xff]  }
 0xa6a   : > { %v1499_v22 = vpop.xlane.xlu1 %1498 }
 0xa6b   : > { %v1500_v23 = vmul.f32 0.0078125, %v1499_v22 }
 0xa6d   : > { %v1501_v24 = vadd.f32 1e-05, %v1500_v23 }
 0xa6f   : > { %2938 = vrsqrt.f32 %v1501_v24 }
 0xa79   : > { %v2939_v25 = vpop.eup %2938 }
 0xa7a   : > { %v1503_v28 = vmul.f32 %v2939_v25, %v3690_v55  ;;  %v2910_v55 = vld [vmem:[#allocation14 + $0x28] sm:$0xff]  }
 0xa7c   : > { %v1510_v30 = vmul.f32 %v2438_v26, %v1503_v28 }
 0xa7e   : > { %v1517_v31 = vadd.f32 %v2439_v29, %v1510_v30 }
 0xa80   : > { %v1518_v32 = vpack.c.bf16 %v1517_v31, %v1517_v31 }
 0xa82   : > { %1519 = vst [vmem:[#allocation3] sm:$0xf] %v1518_v32 }
 0xa89   : > { %v1520_v33 = vld [vmem:[#allocation3] sm:$0xf] }
 0xa8a   : > { %1768 = vmatmul.mubr.bf16.vlgmr.msra.gmra.mrb[28].mxu1 %v1520_v33  ;;  %1809 = vmatmul.mubr.bf16.vlgmr.msra.gmra.mrb[16].mxu0 %v1520_v33 }
 0xa8b   : > { %2544 = vmatpush3.bf16.msra.mxu1 %v2890_v36  ;;  %2566 = vmatpush3.bf16.msra.mxu0 %v2891_v5 }
 0xa8c   : > { %2545 = vmatprep.subr.bf16.mxu1 %v2892_v37  ;;  %2567 = vmatprep.subr.bf16.mxu0 %v2893_v38 }
 0xa8f   : > { %2546 = vmatpush3.bf16.msra.mxu1 %v2894_v39  ;;  %2568 = vmatpush3.bf16.msra.mxu0 %v2895_v40 }
 0xa90   : > { %2547 = vmatprep.subr.bf16.mxu1 %v2896_v41  ;;  %2569 = vmatprep.subr.bf16.mxu0 %v2897_v42 }
 0xa93   : > { %2548 = vmatpush3.bf16.msra.mxu1 %v2898_v43  ;;  %2570 = vmatpush3.bf16.msra.mxu0 %v2899_v44 }
 0xa94   : > { %2549 = vmatprep.subr.bf16.mxu1 %v2900_v45  ;;  %2571 = vmatprep.subr.bf16.mxu0 %v2901_v46 }
 0xa97   : > { %2550 = vmatpush3.bf16.msra.mxu1 %v2902_v47  ;;  %2572 = vmatpush3.bf16.msra.mxu0 %v2903_v48 }
 0xa98   : > { %2551 = vmatprep.subr.bf16.mxu1 %v2904_v49  ;;  %2573 = vmatprep.subr.bf16.mxu0 %v2905_v50 }
 0xa9b   : > { %2552 = vmatpush3.bf16.msra.mxu1 %v2906_v51  ;;  %2574 = vmatpush3.bf16.msra.mxu0 %v2907_v52 }
 0xa9c   : > { %2553 = vmatprep.subr.bf16.mxu1 %v2908_v27  ;;  %2575 = vmatprep.subr.bf16.mxu0 %v2909_v54 }
 0xa9f   : > { %2554 = vmatpush3.bf16.msra.mxu1 %v2910_v55  ;;  %2576 = vmatpush3.bf16.msra.mxu0 %v2911_v2 }
 0xaa0   : > { %2555 = vmatprep.subr.bf16.mxu1 %v2912_v56  ;;  %2577 = vmatprep.subr.bf16.mxu0 %v2913_v57 }
 0xaa3   : > { %2556 = vmatpush3.bf16.msra.mxu1 %v2914_v58  ;;  %2578 = vmatpush3.bf16.msra.mxu0 %v2915_v59 }
 0xaa4   : > { %2557 = vmatprep.subr.bf16.mxu1 %v2916_v60  ;;  %2579 = vmatprep.subr.bf16.mxu0 %v2917_v61 }
 0xaa7   : > { %2558 = vmatpush3.bf16.msra.mxu1 %v2918_v62  ;;  %2580 = vmatpush3.bf16.msra.mxu0 %v2919_v63 }
 0xb5d   : > { %v1769_v12 = vpop.f32.mrb[28].mxu1  ;;  %v1810_v13 = vpop.f32.mrb[16].mxu0 }
 0xb5e   : > { %v1770_v14 = vadd.f32 %v1769_v12, %v1558_v8  ;;  %v1811_v15 = vadd.f32 %v1810_v13, %v1566_v9  ;;  %v1771_v16 = vpop.f32.mrb[29].mxu1  ;;  %v1812_v17 = vpop.f32.mrb[17].mxu0  ;;  %v2504_v12 = vld [vmem:[%s3816_s16] ss:$0 sm:$0xff] }
 0xb5f   : > { %v1772_v19 = vadd.f32 %v1771_v16, %v1562_v10  ;;  %v1813_v20 = vadd.f32 %v1812_v17, %v1570_v11  ;;  %v1773_v21 = vpop.f32.mrb[30].mxu1  ;;  %v1814_v22 = vpop.f32.mrb[18].mxu0 }
 0xb60   : > { %v1817_v23 = vmul.f32 %v1770_v14, %v1770_v14  ;;  %v1819_v24 = vmul.f32 %v1811_v15, %v1811_v15  ;;  %v1774_v25 = vpop.f32.mrb[31].mxu1  ;;  %v1815_v26 = vpop.f32.mrb[19].mxu0 }
 0xb61   : > { %v1818_v28 = vmul.f32 %v1772_v19, %v1772_v19  ;;  %v1820_v29 = vmul.f32 %v1813_v20, %v1813_v20 }
 0xb62   : > { %v1821_v30 = vmul.f32 %v1817_v23, %v1770_v14  ;;  %v1823_v31 = vmul.f32 %v1819_v24, %v1811_v15 }
 0xb63   : > { %v1822_v32 = vmul.f32 %v1818_v28, %v1772_v19  ;;  %v1824_v33 = vmul.f32 %v1820_v29, %v1813_v20 }
 0xb64   : > { %v1825_v34 = vmul.f32 0.044715, %v1821_v30  ;;  %v1827_v35 = vmul.f32 0.044715, %v1823_v31 }
 0xb65   : > { %v1826_v36 = vmul.f32 0.044715, %v1822_v32  ;;  %v1828_v5 = vmul.f32 0.044715, %v1824_v33 }
 0xb66   : > { %v1829_v37 = vadd.f32 %v1825_v34, %v1770_v14  ;;  %v1831_v38 = vadd.f32 %v1827_v35, %v1811_v15 }
 0xb67   : > { %v1830_v39 = vadd.f32 %v1826_v36, %v1772_v19  ;;  %v1832_v40 = vadd.f32 %v1828_v5, %v1813_v20 }
 0xb68   : > { %v1833_v41 = vmul.f32 0.7978846, %v1829_v37  ;;  %v1835_v42 = vmul.f32 0.7978846, %v1831_v38 }
 0xb69   : > { %v1834_v43 = vmul.f32 0.7978846, %v1830_v39  ;;  %v1836_v44 = vmul.f32 0.7978846, %v1832_v40 }
 0xb6a   : > { %2940 = vtanh.f32 %v1833_v41 }
 0xb6b   : > { %2942 = vtanh.f32 %v1835_v42 }
 0xb6c   : > { %2944 = vtanh.f32 %v1834_v43 }
 0xb6d   : > { %2946 = vtanh.f32 %v1836_v44 }
 0xb74   : > { %v2941_v45 = vpop.eup %2940 }
 0xb75   : > { %v2943_v46 = vpop.eup %2942  ;;  %v1841_v47 = vadd.f32 1.0, %v2941_v45 }
 0xb76   : > { %v2945_v48 = vpop.eup %2944  ;;  %v1843_v49 = vadd.f32 1.0, %v2943_v46 }
 0xb77   : > { %v2947_v50 = vpop.eup %2946  ;;  %v1842_v51 = vadd.f32 1.0, %v2945_v48  ;;  %v1845_v52 = vmul.f32 0.5, %v1841_v47 }
 0xb78   : > { %v1844_v27 = vadd.f32 1.0, %v2947_v50  ;;  %v1847_v54 = vmul.f32 0.5, %v1843_v49 }
 0xb79   : > { %v1846_v55 = vmul.f32 0.5, %v1842_v51  ;;  %v1849_v56 = vmul.f32 %v1845_v52, %v1770_v14 }
 0xb7a   : > { %v1848_v2 = vmul.f32 0.5, %v1844_v27  ;;  %v1851_v58 = vmul.f32 %v1847_v54, %v1811_v15 }
 0xb7b   : > { %v1850_v57 = vmul.f32 %v1846_v55, %v1772_v19  ;;  %v1853_v62 = vpack.c.bf16 %v1849_v56, %v1849_v56 }
 0xb7c   : > { %v1852_v59 = vmul.f32 %v1848_v2, %v1813_v20  ;;  %v1855_v63 = vpack.c.bf16 %v1851_v58, %v1851_v58 }
 0xb7d   : > { %v1854_v60 = vpack.c.bf16 %v1850_v57, %v1850_v57 }
 0xb7e   : > { %v1856_v61 = vpack.c.bf16 %v1852_v59, %v1852_v59 }
 0xb7f   : > { %2145 = vmatprep.mubr.bf16.mxu1 %v1854_v60 }
 0xb80   : > { %2185 = vmatprep.mubr.bf16.mxu0 %v1856_v61  ;;  %2146 = vmatmul.mubr.bf16.vlgmr.msra.gmra.mrb[32].mxu1 %v1853_v62 }
 0xb81   : > { %2186 = vmatmul.mubr.bf16.vlgmr.msra.gmra.mrb[20].mxu0 %v1855_v63 }
 0xc53   : > { %v2559_v0 = vpop.f32.mrb[32].mxu1 }
 0xc54   : > { %v2581_v1 = vpop.f32.mrb[20].mxu0  ;;  %v2560_v3 = vpop.f32.mrb[33].mxu1 }
 0xc55   : > { %v2561_v4 = vadd.f32 %v2560_v3, %v2559_v0  ;;  %v2582_v53 = vpop.f32.mrb[21].mxu0  ;;  %v2562_v6 = vpop.f32.mrb[34].mxu1 }
 0xc56   : > { %v2583_v7 = vadd.f32 %v2582_v53, %v2581_v1  ;;  %v2584_v8 = vpop.f32.mrb[22].mxu0  ;;  %v2563_v9 = vpop.f32.mrb[35].mxu1 }
 0xc57   : > { %v2585_v10 = vpop.f32.mrb[23].mxu0 }
 0xc58   : > { %v2188_v11 = vadd.f32 %v2583_v7, %v2561_v4 }
 0xc5a   : > { %v2209_v13 = vadd.f32 %v2188_v11, %v3686_v18 }
 0xc5c   : > { %v2217_v14 = vadd.f32 %v2504_v12, %v2209_v13 }
 0xc5e   : > { %2218 = vst [vmem:[%s622_s25] sm:$0xff] %v2217_v14 }
 0xc5f   : > { %3131 = shalt.err (!%p3128_p8)
}
 0xc60   : > { %s3132_s4 = scalar_lea.hbm %s3714_s24, 128  ;;  %s3136_s29 = scalar_lea.hbm %s3817_s23, 256 }
 0xc61   : > { %p3133_p9 = scmp.ne.s32.totalorder %s3714_s24, %s3132_s4  ;;  %p3137_p10 = scmp.lt.u32.totalorder %s3714_s24, %s3817_s23 }
 0xc62   : > { %p3138_p4 = scmp.lt.u32.totalorder %s3136_s29, %s3132_s4  ;;  %p3140_p6 = scmp.lt.u32.totalorder %s3132_s4, %s3714_s24 }
 0xc63   : > { %p3134_p1 = pnand %p3133_p9, %p3818_p2 }
 0xc64   : > { %p3139_p13 = por %p3138_p4, %p3137_p10 }
 0xc65   : > { %p3135_p3 = pneg %p3134_p1 }
 0xc66   : > { %p3141_p5 = por %p3140_p6, %p3139_p13 }
 0xc68   : > { %p3142_p7 = pnand %p3141_p5, %p3135_p3 }
 0xc6a   : > { %3145 = shalt.err (!%p3142_p7)
}
 0xc6b   : > { %2697 = dma.vmem_to_hbm [thread:$0]  (%p3818_p2), %s3716_s10, 128, %s3714_s24, %s2220_s1  }
 0xc6c PF: > { %s2245_s5 = sand.u32 1, %s3192_s18   ;;  %p3819_p11 = scmp.ne.s32.totalorder %s3809_s12, 0 }
 0xc6d   : > { %p3820_p12 = scmp.ge.s32.totalorder %s3212_s14, 2  ;;  %s2246_s8 = scalar_lea.sflag [#allocation7], %s2245_s5 }
 0xc6f   : > { %p2720_p0 = pnand %p3820_p12, %p3819_p11 }
 0xc71   : > { %3187 = dma.done.wait (!%p2720_p0), %s2246_s8, 128  }
 0xc72   : > { %3189 = vsyncadd (!%p2720_p0), %s2246_s8, 4294967168  ;;  %s34_s14 = sadd.s32 1, %s3212_s14   ;;  %s3821_s18 = smov %s3196_s19 }
 0xc73   : > { %p31_p8 = scmp.ge.s32.totalorder %s34_s14, 4   ;;  %s3822_s19 = smov %s3200_s20 }
 0xc74   : > { %s3823_s20 = smov %s3507_s26  ;;  %s3824_s13 = smov %s3208_s21 }
 0xc75   : > { %s3825_s21 = smov %s3827_s27  ;;  %33 = sbr.rel (!%p31_p8) target bundleno = 17 (0x11), region = 166 }
 0xc7c   :  { %2251 = vsyncpa [#allocation6], 1 }
 0xc7d   :  { %2253 = vsyncpa [#allocation6 + $0x1], 1 }
 0xc7e   :  { %2254 = vsyncpa [#allocation9], 1 }
 0xc7f   :  { %2255 = vsyncpa [#allocation12], 1 }
 0xc80   :  { %2256 = vsyncpa [#allocation15], 1 }
 0xc81   :  { %2257 = vsyncpa [#allocation7], 1 }
 0xc82   :  { %2259 = vsyncpa [#allocation7 + $0x1], 1 }

</bundles_post_ra>
